<compile_context>
chip_gen: v7x
topology: tpu7x:2x2x1
jax: 0.10.0
libtpu: 0.0.40
codegen_flags: <defaults>
</compile_context>

<pallas_src>
import jax
import jax.numpy as jnp
import numpy as np
from jax.experimental import pallas as pl
from jax.experimental.pallas import tpu as pltpu


_C1 = 0.01 ** 2
_C2 = 0.03 ** 2


def _gaussian_1d(filter_size: int, sigma: float = 1.5) -> np.ndarray:
    coords = np.arange(filter_size, dtype=np.float64) - filter_size // 2
    g = np.exp(-(coords ** 2) / (2.0 * sigma ** 2))
    return g / g.sum()


def _conv_matrix(n: int, g: np.ndarray, pad: int) -> np.ndarray:
    """M[i_in, i_out] so that (X @ M) is the zero-padded 'same' 1-D conv of X's rows."""
    fs = len(g)
    m = np.zeros((n, n), dtype=np.float64)
    for i_out in range(n):
        for t in range(fs):
            i_in = i_out + t - pad
            if 0 <= i_in < n:
                m[i_in, i_out] += g[t]
    return m


def _ssim_partial_kernel(x_ref, y_ref, ah_ref, bw_ref, acc_ref):
    # acc_ref: (H, W) VMEM-resident accumulator shared across grid steps.
    @pl.when(pl.program_id(0) == 0)
    def _():
        acc_ref[...] = jnp.zeros_like(acc_ref)

    x = x_ref[...].astype(jnp.float32)      # (P, H, W)
    y = y_ref[...].astype(jnp.float32)      # (P, H, W)
    ah = ah_ref[...]                        # (P, H, H) left (column-conv) matrix
    bw = bw_ref[...]                        # (P, W, W) right (row-conv) matrix

    def gconv(m):
        # Separable Gaussian 'same' conv with zero padding: A_h @ m @ B_w (per plane).
        t = jnp.einsum('phk,pkw->phw', ah, m, preferred_element_type=jnp.float32)
        return jnp.einsum('phw,pwj->phj', t, bw, preferred_element_type=jnp.float32)

    mu_x = gconv(x)
    mu_y = gconv(y)
    e_xx = gconv(x * x)
    e_yy = gconv(y * y)
    e_xy = gconv(x * y)

    mu_x2 = mu_x * mu_x
    mu_y2 = mu_y * mu_y
    mu_xy = mu_x * mu_y
    sigma_x = e_xx - mu_x2
    sigma_y = e_yy - mu_y2
    sigma_xy = e_xy - mu_xy

    num = (2.0 * mu_xy + _C1) * (2.0 * sigma_xy + _C2)
    den = (mu_x2 + mu_y2 + _C1) * (sigma_x + sigma_y + _C2)
    ssim_map = num / den                    # (P, H, W)

    # Reduce only over the plane axis (plain vector adds, no cross-lane XLU work),
    # then accumulate element-wise into the resident (H, W) output.
    acc_ref[...] = acc_ref[...] + jnp.sum(ssim_map, axis=0)


def _planes_per_step(n_planes: int, h: int, w: int,
                     max_block_bytes: int = 512 * 1024) -> int:
    best = 1
    for p in range(1, n_planes + 1):
        if n_planes % p == 0 and p * h * w * 4 <= max_block_bytes:
            best = p
    return best


def ssim_loss(output, target, *, channel: int, filter_size: int):
    """1 - mean SSIM, NCHW float inputs with values in [0, 1]."""
    N, C, H, W = output.shape
    assert C == channel, "channel mismatch with module config"
    NC = N * C
    pad = filter_size // 2

    g = _gaussian_1d(filter_size)
    # Z = A_h @ X is the column ('same', zero-padded) conv; Y = X @ B_w is the row conv.
    b_w = _conv_matrix(W, g, pad)            # (W, W), right-multiply
    a_h = _conv_matrix(H, g, pad).T          # (H, H), left-multiply

    P = _planes_per_step(NC, H, W)
    G = NC // P
    # TODO(synk): spatially tile very large planes (with a filter-size halo) instead
    # of loading a full (P, H, W) block, to respect v7x's 64 MiB VMEM.

    x = output.reshape(NC, H, W)
    y = target.reshape(NC, H, W)
    ah_b = jnp.asarray(
        np.ascontiguousarray(np.broadcast_to(a_h[None], (P, H, H))), jnp.float32)
    bw_b = jnp.asarray(
        np.ascontiguousarray(np.broadcast_to(b_w[None], (P, W, W))), jnp.float32)

    acc = pl.pallas_call(
        _ssim_partial_kernel,
        out_shape=jax.ShapeDtypeStruct((H, W), jnp.float32),
        grid_spec=pltpu.PrefetchScalarGridSpec(
            num_scalar_prefetch=0,
            grid=(G,),
            in_specs=[
                pl.BlockSpec((P, H, W), lambda i: (i, 0, 0)),
                pl.BlockSpec((P, H, W), lambda i: (i, 0, 0)),
                pl.BlockSpec((P, H, H), lambda i: (0, 0, 0)),
                pl.BlockSpec((P, W, W), lambda i: (0, 0, 0)),
            ],
            out_specs=pl.BlockSpec((H, W), lambda i: (0, 0)),
        ),
        compiler_params=pltpu.CompilerParams(
            dimension_semantics=("arbitrary",)),
    )(x, y, ah_b, bw_b)

    mssim = jnp.sum(acc) / jnp.float32(NC * H * W)
    return 1.0 - mssim


def _ssim_loss_reference(output, target, filter_size):
    """Pure-JAX (XLA) reference: direct 2-D depthwise conv, for validation."""
    fs = filter_size
    pad = fs // 2
    g = _gaussian_1d(fs)
    w2d = np.outer(g, g)
    w2d = (w2d / w2d.sum()).astype(np.float32)

    x = output.astype(jnp.float32)
    y = target.astype(jnp.float32)
    N, C, H, W = x.shape
    xp = jnp.pad(x, ((0, 0), (0, 0), (pad, pad), (pad, pad)))
    yp = jnp.pad(y, ((0, 0), (0, 0), (pad, pad), (pad, pad)))

    def conv(zp):
        out = jnp.zeros((N, C, H, W), jnp.float32)
        for a in range(fs):
            for b in range(fs):
                out = out + float(w2d[a, b]) * zp[:, :, a:a + H, b:b + W]
        return out

    mu_x = conv(xp)
    mu_y = conv(yp)
    e_xx = conv(xp * xp)
    e_yy = conv(yp * yp)
    e_xy = conv(xp * yp)

    mu_x2, mu_y2, mu_xy = mu_x * mu_x, mu_y * mu_y, mu_x * mu_y
    sigma_x, sigma_y, sigma_xy = e_xx - mu_x2, e_yy - mu_y2, e_xy - mu_xy
    num = (2.0 * mu_xy + _C1) * (2.0 * sigma_xy + _C2)
    den = (mu_x2 + mu_y2 + _C1) * (sigma_x + sigma_y + _C2)
    return 1.0 - jnp.mean(num / den)


if __name__ == "__main__":
    # Small deterministic example consistent with SSIMLoss(channel=4, filter_size=7)
    key = jax.random.PRNGKey(0)
    k1, k2 = jax.random.split(key)
    N, C, H, W = 2, 4, 16, 16
    filter_size = 7

    output = jax.random.uniform(k1, (N, C, H, W), dtype=jnp.float32)
    target = jax.random.uniform(k2, (N, C, H, W), dtype=jnp.float32)

    loss = ssim_loss(output, target, channel=C, filter_size=filter_size)
    jax.block_until_ready(loss)

    assert bool(jnp.isfinite(loss)), "SSIM loss is not finite"

    # Numerical check against a pure-JAX direct-conv reference.
    ref = _ssim_loss_reference(output, target, filter_size)
    assert abs(float(loss) - float(ref)) < 1e-3, (float(loss), float(ref))

    print("KERNEL_OK")
</pallas_src>

<mosaic_0001>
module attributes {stable_mosaic.version = 11 : i64} {
  func.func @_ssim_partial_kernel(%arg0: i32, %arg1: memref<8x16x16xf32, #tpu.memory_space<vmem>>, %arg2: memref<8x16x16xf32, #tpu.memory_space<vmem>>, %arg3: memref<8x16x16xf32, #tpu.memory_space<vmem>>, %arg4: memref<8x16x16xf32, #tpu.memory_space<vmem>>, %arg5: memref<16x16xf32, #tpu.memory_space<vmem>>) attributes {dimension_semantics = [#tpu.dimension_semantics<arbitrary>], iteration_bounds = array<i64: 1>, scalar_prefetch = 0 : i64, scratch_operands = 0 : i64, tpu.core_type = #tpu.core_type<tc>, window_params = [{transform_indices = @transform_0, window_bounds = array<i64: 8, 16, 16>}, {transform_indices = @transform_1, window_bounds = array<i64: 8, 16, 16>}, {pipeline_mode = #tpu.pipeline_mode<synchronous>, transform_indices = @transform_2, window_bounds = array<i64: 8, 16, 16>}, {pipeline_mode = #tpu.pipeline_mode<synchronous>, transform_indices = @transform_3, window_bounds = array<i64: 8, 16, 16>}, {pipeline_mode = #tpu.pipeline_mode<synchronous>, transform_indices = @transform_4, window_bounds = array<i64: 16, 16>}]} {
    %c0_i32 = arith.constant 0 : i32
    %0 = arith.cmpi eq, %arg0, %c0_i32 : i32
    %1 = arith.extui %0 : i1 to i32
    %c0_i32_0 = arith.constant 0 : i32
    %2 = arith.cmpi ne, %1, %c0_i32_0 : i32
    scf.if %2 {
      %cst_32 = arith.constant 0.000000e+00 : f32
      %47 = vector.broadcast %cst_32 : f32 to vector<16x16xf32>
      %c0_33 = arith.constant 0 : index
      %c0_34 = arith.constant 0 : index
      %48 = vector.load %arg5[%c0_33, %c0_34] : memref<16x16xf32, #tpu.memory_space<vmem>>, vector<16x16xf32>
      tpu.vector_store %arg5[%c0_33, %c0_34], %47 {strides = array<i32>} : memref<16x16xf32, #tpu.memory_space<vmem>>, vector<16x16xf32>,
    } else {
    }
    %c0 = arith.constant 0 : index
    %c0_1 = arith.constant 0 : index
    %c0_2 = arith.constant 0 : index
    %3 = vector.load %arg1[%c0, %c0_1, %c0_2] : memref<8x16x16xf32, #tpu.memory_space<vmem>>, vector<8x16x16xf32>
    %c0_3 = arith.constant 0 : index
    %c0_4 = arith.constant 0 : index
    %c0_5 = arith.constant 0 : index
    %4 = vector.load %arg2[%c0_3, %c0_4, %c0_5] : memref<8x16x16xf32, #tpu.memory_space<vmem>>, vector<8x16x16xf32>
    %c0_6 = arith.constant 0 : index
    %c0_7 = arith.constant 0 : index
    %c0_8 = arith.constant 0 : index
    %5 = vector.load %arg3[%c0_6, %c0_7, %c0_8] : memref<8x16x16xf32, #tpu.memory_space<vmem>>, vector<8x16x16xf32>
    %c0_9 = arith.constant 0 : index
    %c0_10 = arith.constant 0 : index
    %c0_11 = arith.constant 0 : index
    %6 = vector.load %arg4[%c0_9, %c0_10, %c0_11] : memref<8x16x16xf32, #tpu.memory_space<vmem>>, vector<8x16x16xf32>
    "tpu.trace_start"() <{level = 10 : i32, message = "phk,pkw->phw"}> : () -> ()
    %cst = arith.constant dense<0.000000e+00> : vector<8x16x16xf32>
    %7 = tpu.matmul %5, %3, %cst {dimension_numbers = #tpu.dot_dimension_numbers<[2], [1], [1], [2], [0, 0, 0, 1, 1, 2], [0], [0]>} : vector<8x16x16xf32>, vector<8x16x16xf32>, vector<8x16x16xf32> -> vector<8x16x16xf32>
    "tpu.trace_stop"() : () -> ()
    "tpu.trace_start"() <{level = 10 : i32, message = "phw,pwj->phj"}> : () -> ()
    %cst_12 = arith.constant dense<0.000000e+00> : vector<8x16x16xf32>
    %8 = tpu.matmul %7, %6, %cst_12 {dimension_numbers = #tpu.dot_dimension_numbers<[2], [1], [1], [2], [0, 0, 0, 1, 1, 2], [0], [0]>} : vector<8x16x16xf32>, vector<8x16x16xf32>, vector<8x16x16xf32> -> vector<8x16x16xf32>
    "tpu.trace_stop"() : () -> ()
    "tpu.trace_start"() <{level = 10 : i32, message = "phk,pkw->phw"}> : () -> ()
    %cst_13 = arith.constant dense<0.000000e+00> : vector<8x16x16xf32>
    %9 = tpu.matmul %5, %4, %cst_13 {dimension_numbers = #tpu.dot_dimension_numbers<[2], [1], [1], [2], [0, 0, 0, 1, 1, 2], [0], [0]>} : vector<8x16x16xf32>, vector<8x16x16xf32>, vector<8x16x16xf32> -> vector<8x16x16xf32>
    "tpu.trace_stop"() : () -> ()
    "tpu.trace_start"() <{level = 10 : i32, message = "phw,pwj->phj"}> : () -> ()
    %cst_14 = arith.constant dense<0.000000e+00> : vector<8x16x16xf32>
    %10 = tpu.matmul %9, %6, %cst_14 {dimension_numbers = #tpu.dot_dimension_numbers<[2], [1], [1], [2], [0, 0, 0, 1, 1, 2], [0], [0]>} : vector<8x16x16xf32>, vector<8x16x16xf32>, vector<8x16x16xf32> -> vector<8x16x16xf32>
    "tpu.trace_stop"() : () -> ()
    %11 = arith.mulf %3, %3 : vector<8x16x16xf32>
    "tpu.trace_start"() <{level = 10 : i32, message = "phk,pkw->phw"}> : () -> ()
    %cst_15 = arith.constant dense<0.000000e+00> : vector<8x16x16xf32>
    %12 = tpu.matmul %5, %11, %cst_15 {dimension_numbers = #tpu.dot_dimension_numbers<[2], [1], [1], [2], [0, 0, 0, 1, 1, 2], [0], [0]>} : vector<8x16x16xf32>, vector<8x16x16xf32>, vector<8x16x16xf32> -> vector<8x16x16xf32>
    "tpu.trace_stop"() : () -> ()
    "tpu.trace_start"() <{level = 10 : i32, message = "phw,pwj->phj"}> : () -> ()
    %cst_16 = arith.constant dense<0.000000e+00> : vector<8x16x16xf32>
    %13 = tpu.matmul %12, %6, %cst_16 {dimension_numbers = #tpu.dot_dimension_numbers<[2], [1], [1], [2], [0, 0, 0, 1, 1, 2], [0], [0]>} : vector<8x16x16xf32>, vector<8x16x16xf32>, vector<8x16x16xf32> -> vector<8x16x16xf32>
    "tpu.trace_stop"() : () -> ()
    %14 = arith.mulf %4, %4 : vector<8x16x16xf32>
    "tpu.trace_start"() <{level = 10 : i32, message = "phk,pkw->phw"}> : () -> ()
    %cst_17 = arith.constant dense<0.000000e+00> : vector<8x16x16xf32>
    %15 = tpu.matmul %5, %14, %cst_17 {dimension_numbers = #tpu.dot_dimension_numbers<[2], [1], [1], [2], [0, 0, 0, 1, 1, 2], [0], [0]>} : vector<8x16x16xf32>, vector<8x16x16xf32>, vector<8x16x16xf32> -> vector<8x16x16xf32>
    "tpu.trace_stop"() : () -> ()
    "tpu.trace_start"() <{level = 10 : i32, message = "phw,pwj->phj"}> : () -> ()
    %cst_18 = arith.constant dense<0.000000e+00> : vector<8x16x16xf32>
    %16 = tpu.matmul %15, %6, %cst_18 {dimension_numbers = #tpu.dot_dimension_numbers<[2], [1], [1], [2], [0, 0, 0, 1, 1, 2], [0], [0]>} : vector<8x16x16xf32>, vector<8x16x16xf32>, vector<8x16x16xf32> -> vector<8x16x16xf32>
    "tpu.trace_stop"() : () -> ()
    %17 = arith.mulf %3, %4 : vector<8x16x16xf32>
    "tpu.trace_start"() <{level = 10 : i32, message = "phk,pkw->phw"}> : () -> ()
    %cst_19 = arith.constant dense<0.000000e+00> : vector<8x16x16xf32>
    %18 = tpu.matmul %5, %17, %cst_19 {dimension_numbers = #tpu.dot_dimension_numbers<[2], [1], [1], [2], [0, 0, 0, 1, 1, 2], [0], [0]>} : vector<8x16x16xf32>, vector<8x16x16xf32>, vector<8x16x16xf32> -> vector<8x16x16xf32>
    "tpu.trace_stop"() : () -> ()
    "tpu.trace_start"() <{level = 10 : i32, message = "phw,pwj->phj"}> : () -> ()
    %cst_20 = arith.constant dense<0.000000e+00> : vector<8x16x16xf32>
    %19 = tpu.matmul %18, %6, %cst_20 {dimension_numbers = #tpu.dot_dimension_numbers<[2], [1], [1], [2], [0, 0, 0, 1, 1, 2], [0], [0]>} : vector<8x16x16xf32>, vector<8x16x16xf32>, vector<8x16x16xf32> -> vector<8x16x16xf32>
    "tpu.trace_stop"() : () -> ()
    %20 = arith.mulf %8, %8 : vector<8x16x16xf32>
    %21 = arith.mulf %10, %10 : vector<8x16x16xf32>
    %22 = arith.mulf %8, %10 : vector<8x16x16xf32>
    %23 = arith.subf %13, %20 : vector<8x16x16xf32>
    %24 = arith.subf %16, %21 : vector<8x16x16xf32>
    %25 = arith.subf %19, %22 : vector<8x16x16xf32>
    %cst_21 = arith.constant 2.000000e+00 : f32
    %26 = vector.broadcast %cst_21 : f32 to vector<8x16x16xf32>
    %27 = arith.mulf %26, %22 : vector<8x16x16xf32>
    %cst_22 = arith.constant 9.99999974E-5 : f32
    %28 = vector.broadcast %cst_22 : f32 to vector<8x16x16xf32>
    %29 = arith.addf %27, %28 : vector<8x16x16xf32>
    %cst_23 = arith.constant 2.000000e+00 : f32
    %30 = vector.broadcast %cst_23 : f32 to vector<8x16x16xf32>
    %31 = arith.mulf %30, %25 : vector<8x16x16xf32>
    %cst_24 = arith.constant 8.99999984E-4 : f32
    %32 = vector.broadcast %cst_24 : f32 to vector<8x16x16xf32>
    %33 = arith.addf %31, %32 : vector<8x16x16xf32>
    %34 = arith.mulf %29, %33 : vector<8x16x16xf32>
    %35 = arith.addf %20, %21 : vector<8x16x16xf32>
    %cst_25 = arith.constant 9.99999974E-5 : f32
    %36 = vector.broadcast %cst_25 : f32 to vector<8x16x16xf32>
    %37 = arith.addf %35, %36 : vector<8x16x16xf32>
    %38 = arith.addf %23, %24 : vector<8x16x16xf32>
    %cst_26 = arith.constant 8.99999984E-4 : f32
    %39 = vector.broadcast %cst_26 : f32 to vector<8x16x16xf32>
    %40 = arith.addf %38, %39 : vector<8x16x16xf32>
    %41 = arith.mulf %37, %40 : vector<8x16x16xf32>
    %42 = arith.divf %34, %41 : vector<8x16x16xf32>
    %c0_27 = arith.constant 0 : index
    %c0_28 = arith.constant 0 : index
    %43 = vector.load %arg5[%c0_27, %c0_28] : memref<16x16xf32, #tpu.memory_space<vmem>>, vector<16x16xf32>
    %cst_29 = arith.constant dense<0.000000e+00> : vector<16x16xf32>
    %44 = vector.multi_reduction <add>, %42, %cst_29 [0] : vector<8x16x16xf32> to vector<16x16xf32>
    %45 = arith.addf %43, %44 : vector<16x16xf32>
    %c0_30 = arith.constant 0 : index
    %c0_31 = arith.constant 0 : index
    %46 = vector.load %arg5[%c0_30, %c0_31] : memref<16x16xf32, #tpu.memory_space<vmem>>, vector<16x16xf32>
    tpu.vector_store %arg5[%c0_30, %c0_31], %45 {strides = array<i32>} : memref<16x16xf32, #tpu.memory_space<vmem>>, vector<16x16xf32>,
    return
  }
  func.func @transform_0(%arg0: i32) -> (i32, i32, i32) {
    %c0_i32 = arith.constant 0 : i32
    %c0_i32_0 = arith.constant 0 : i32
    %c0_i32_1 = arith.constant 0 : i32
    return %arg0, %c0_i32, %c0_i32_0 : i32, i32, i32
  }
  func.func @transform_1(%arg0: i32) -> (i32, i32, i32) {
    %c0_i32 = arith.constant 0 : i32
    %c0_i32_0 = arith.constant 0 : i32
    %c0_i32_1 = arith.constant 0 : i32
    return %arg0, %c0_i32, %c0_i32_0 : i32, i32, i32
  }
  func.func @transform_2(%arg0: i32) -> (i32, i32, i32) {
    %c0_i32 = arith.constant 0 : i32
    %c0_i32_0 = arith.constant 0 : i32
    %c0_i32_1 = arith.constant 0 : i32
    %c0_i32_2 = arith.constant 0 : i32
    return %c0_i32, %c0_i32_0, %c0_i32_1 : i32, i32, i32
  }
  func.func @transform_3(%arg0: i32) -> (i32, i32, i32) {
    %c0_i32 = arith.constant 0 : i32
    %c0_i32_0 = arith.constant 0 : i32
    %c0_i32_1 = arith.constant 0 : i32
    %c0_i32_2 = arith.constant 0 : i32
    return %c0_i32, %c0_i32_0, %c0_i32_1 : i32, i32, i32
  }
  func.func @transform_4(%arg0: i32) -> (i32, i32) {
    %c0_i32 = arith.constant 0 : i32
    %c0_i32_0 = arith.constant 0 : i32
    %c0_i32_1 = arith.constant 0 : i32
    return %c0_i32, %c0_i32_0 : i32, i32
  }
}

</mosaic_0001>

<bundles_post_ra>
// kernel: tpu_custom_call.1
= control target key start
LH: loop header
LB: loop body
LE: loop exit
PB: predicated region body
PF: predicated region fallthrough
CT: control target
= control target key end

     0   :  { %9 = vsyncpa [#allocation3], 0  ;;  %s9577_s0 = inlined_call_operand.hbm [shape: f32[8,16,16], index: 0, kind: input, shape index: {}]   ;;  %s9578_s1 = inlined_call_operand.hbm [shape: f32[8,16,16], index: 1, kind: input, shape index: {}]   ;;  %s9579_s2 = inlined_call_operand.hbm [shape: f32[8,16,16], index: 2, kind: input, shape index: {}]   ;;  %s9580_s3 = inlined_call_operand.hbm [shape: f32[8,16,16], index: 3, kind: input, shape index: {}]   ;;  %s9581_s4 = inlined_call_operand.hbm [shape: f32[16,16], index: 4, kind: output, shape index: {}]  }
   0x1   :  { %10 = vsyncpa [#allocation6], 0 }
   0x2   :  { %11 = vsyncpa [#allocation9], 0 }
   0x3   :  { %12 = vsyncpa [#allocation4], 0  ;;  %s8374_s15 = smov [#allocation5]   ;;  %s8375_s17 = smov [#allocation2]  }
   0x4   :  { %s30_s16 = sshll.u32 %s8374_s15, 4  ;;  %s18_s18 = sshll.u32 %s8375_s17, 4  ;;  %s31_s16 = int_to_ptr.vmem [resolvable:$true] %s30_s16  ;;  %s8407_s18 = int_to_ptr.vmem [resolvable:$true] %s18_s18 }
   0x5   :  { %s8256_s21 = scalar_lea.hbm %s9578_s1, 2048 }
   0x6   :  { %p8257_p0 = scmp.ne.s32.totalorder %s9578_s1, %s8256_s21  ;;  %p8260_p1 = scmp.lt.u32.totalorder %s8256_s21, %s9578_s1 }
   0x8   :  { %p8262_p2 = pnand %p8260_p1, %p8257_p0 }
   0xa   :  { %8265 = shalt.err (!%p8262_p2)
}
   0xb   :  { %s8266_s26 = scalar_lea.vmem %s31_s16, 2048  ;;  %p8271_p4 = scmp.lt.s32.totalorder %s31_s16, %s31_s16 }
   0xc   :  { %p8267_p3 = scmp.ne.s32.totalorder %s31_s16, %s8266_s26  ;;  %p8272_p5 = scmp.lt.s32.totalorder %s8266_s26, %s8266_s26 }
   0xe   :  { %p8273_p6 = por %p8272_p5, %p8271_p4 }
  0x10   :  { %p8274_p7 = pnand %p8273_p6, %p8267_p3 }
  0x12   :  { %8277 = shalt.err (!%p8274_p7)
}
  0x13   :  { %s8376_s27 = smov 128   ;;  %s8377_s28 = smov 8  }
  0x14   :  { %36 = dma.hbm_to_vmem [thread:$0]  %s9578_s1, 2048, %s31_s16, [#allocation6], %s8376_s27, %s8376_s27, %s8377_s28  }
  0x15   :  { %s8278_s7 = scalar_lea.hbm %s9577_s0, 2048 }
  0x16   :  { %p8279_p8 = scmp.ne.s32.totalorder %s9577_s0, %s8278_s7  ;;  %p8282_p9 = scmp.lt.u32.totalorder %s8278_s7, %s9577_s0 }
  0x18   :  { %p8284_p10 = pnand %p8282_p9, %p8279_p8 }
  0x1a   :  { %8287 = shalt.err (!%p8284_p10)
}
  0x1b   :  { %s8288_s12 = scalar_lea.vmem %s8407_s18, 2048  ;;  %p8293_p12 = scmp.lt.s32.totalorder %s8407_s18, %s8407_s18 }
  0x1c   :  { %p8289_p11 = scmp.ne.s32.totalorder %s8407_s18, %s8288_s12  ;;  %p8294_p13 = scmp.lt.s32.totalorder %s8288_s12, %s8288_s12 }
  0x1e   :  { %p8295_p0 = por %p8294_p13, %p8293_p12 }
  0x20   :  { %p8296_p1 = pnand %p8295_p0, %p8289_p11 }
  0x22   :  { %8299 = shalt.err (!%p8296_p1)
}
  0x23   :  { %24 = dma.hbm_to_vmem [thread:$0]  %s9577_s0, 2048, %s8407_s18, [#allocation3], %s8376_s27, %s8376_s27, %s8377_s28  }
  0x24   :  { %s8378_s14 = smov [#allocation7]   ;;  %s8379_s16 = smov [#allocation8]  }
  0x25   :  { %s42_s15 = sshll.u32 %s8378_s14, 4  ;;  %s54_s17 = sshll.u32 %s8379_s16, 4  ;;  %s43_s15 = int_to_ptr.vmem [resolvable:$true] %s42_s15  ;;  %s8444_s17 = int_to_ptr.vmem [resolvable:$true] %s54_s17 }
  0x26   :  { %s8300_s21 = scalar_lea.hbm %s9579_s2, 2048 }
  0x27   :  { %p8301_p2 = scmp.ne.s32.totalorder %s9579_s2, %s8300_s21  ;;  %p8304_p3 = scmp.lt.u32.totalorder %s8300_s21, %s9579_s2 }
  0x29   :  { %p8306_p4 = pnand %p8304_p3, %p8301_p2 }
  0x2b   :  { %8309 = shalt.err (!%p8306_p4)
}
  0x2c   :  { %s8310_s0 = scalar_lea.vmem %s43_s15, 2048  ;;  %p8315_p6 = scmp.lt.s32.totalorder %s43_s15, %s43_s15 }
  0x2d   :  { %p8311_p5 = scmp.ne.s32.totalorder %s43_s15, %s8310_s0  ;;  %p8316_p7 = scmp.lt.s32.totalorder %s8310_s0, %s8310_s0 }
  0x2f   :  { %p8317_p8 = por %p8316_p7, %p8315_p6 }
  0x31   :  { %p8318_p9 = pnand %p8317_p8, %p8311_p5 }
  0x33   :  { %8321 = shalt.err (!%p8318_p9)
}
  0x34   :  { %48 = dma.hbm_to_vmem [thread:$0]  %s9579_s2, 2048, %s43_s15, [#allocation6], %s8376_s27, %s8376_s27, %s8377_s28  }
  0x35   :  { %s8322_s5 = scalar_lea.hbm %s9580_s3, 2048 }
  0x36   :  { %p8323_p10 = scmp.ne.s32.totalorder %s9580_s3, %s8322_s5  ;;  %p8326_p11 = scmp.lt.u32.totalorder %s8322_s5, %s9580_s3 }
  0x38   :  { %p8328_p12 = pnand %p8326_p11, %p8323_p10 }
  0x3a   :  { %8331 = shalt.err (!%p8328_p12)
}
  0x3b   :  { %s8332_s10 = scalar_lea.vmem %s8444_s17, 2048  ;;  %p8337_p0 = scmp.lt.s32.totalorder %s8444_s17, %s8444_s17 }
  0x3c   :  { %p8333_p13 = scmp.ne.s32.totalorder %s8444_s17, %s8332_s10  ;;  %p8338_p1 = scmp.lt.s32.totalorder %s8332_s10, %s8332_s10 }
  0x3e   :  { %p8339_p2 = por %p8338_p1, %p8337_p0 }
  0x40   :  { %p8340_p3 = pnand %p8339_p2, %p8333_p13 }
  0x42   :  { %8343 = shalt.err (!%p8340_p3)
}
  0x43   :  { %60 = dma.hbm_to_vmem [thread:$0]  %s9580_s3, 2048, %s8444_s17, [#allocation9], %s8376_s27, %s8376_s27, %s8377_s28  }
  0x44   :  { %8366 = dma.done.wait [#allocation3], 2048  }
  0x45   :  { %8367 = vsyncadd [#allocation3], 4294965248 }
  0x46   :  { %8368 = dma.done.wait [#allocation6], 4096  }
  0x47   :  { %8369 = vsyncadd [#allocation6], 4294963200 }
  0x48   :  { %8370 = dma.done.wait [#allocation9], 2048  }
  0x49   :  { %8371 = vsyncadd [#allocation9], 4294965248  ;;  %vm77_vm0 = vcmask 130048   ;;  %v8481_v0 = vld [vmem:[#allocation2] sm:$0xff]  ;;  %v8483_v1 = vld [vmem:[#allocation2 + $0x8] sm:$0xff]  ;;  %s8381_s3 = smov [#allocation10]  }
  0x4a   :  { %v8485_v2 = vld [vmem:[#allocation2 + $0x10] sm:$0xff]  ;;  %v7864_v3 = vpack.c.bf16 %v8483_v1, %v8481_v0  ;;  %v8489_v4 = vld [vmem:[#allocation2 + $0x18] sm:$0xff]  ;;  %v8491_v5 = vld [vmem:[#allocation7] sm:$0xff]  ;;  %s6810_s12 = sshll.u32 %s8381_s3, 4  ;;  %s6811_s12 = int_to_ptr.vmem [resolvable:$true] %s6810_s12 }
  0x4b   :  { %v8493_v6 = vld [vmem:[#allocation7 + $0x10] sm:$0xff]  ;;  %v7868_v7 = vpack.c.bf16 %v8489_v4, %v8485_v2  ;;  %7308 = vmatprep.mubr.msk.f32.mxu0 %vm77_vm0, %v8491_v5  ;;  %v8501_v8 = vld [vmem:[#allocation2 + $0x20] sm:$0xff]  ;;  %v8503_v9 = vld [vmem:[#allocation2 + $0x28] sm:$0xff]  ;;  %s8344_s1 = scalar_lea.vmem %s6811_s12, 256  ;;  %p8349_p5 = scmp.lt.s32.totalorder %s6811_s12, %s6811_s12 }
  0x4c   :  { %7315 = vmatprep.mubr.msk.f32.mxu1 %vm77_vm0, %v8493_v6  ;;  %7865 = vmatprep.subr.bf16.mxu0 %v7864_v3  ;;  %v8505_v10 = vld [vmem:[#allocation2 + $0x30] sm:$0xff]  ;;  %v8507_v11 = vld [vmem:[#allocation2 + $0x38] sm:$0xff]  ;;  %v8509_v12 = vld [vmem:[#allocation7 + $0x8] sm:$0xff]  ;;  %v7872_v13 = vpack.c.bf16 %v8503_v9, %v8501_v8  ;;  %p8345_p4 = scmp.ne.s32.totalorder %s6811_s12, %s8344_s1  ;;  %p8350_p6 = scmp.lt.s32.totalorder %s8344_s1, %s8344_s1 }
  0x4d   :  { %7869 = vmatprep.subr.bf16.mxu1 %v7868_v7  ;;  %7867 = vmatpush3.bf16.msra.mxu0 %v7864_v3  ;;  %v7876_v14 = vpack.c.bf16 %v8507_v11, %v8505_v10  ;;  %v8515_v15 = vld [vmem:[#allocation7 + $0x18] sm:$0xff]  ;;  %v8517_v16 = vld [vmem:[#allocation2 + $0x40] sm:$0xff]  ;;  %v8519_v17 = vld [vmem:[#allocation2 + $0x48] sm:$0xff] }
  0x4e   :  { %7871 = vmatpush3.bf16.msra.mxu1 %v7868_v7  ;;  %7873 = vmatprep.subr.bf16.mxu0 %v7872_v13  ;;  %v8521_v18 = vld [vmem:[#allocation7 + $0x20] sm:$0xff]  ;;  %v7880_v19 = vpack.c.bf16 %v8519_v17, %v8517_v16  ;;  %v8525_v20 = vld [vmem:[#allocation2 + $0x50] sm:$0xff]  ;;  %v8527_v21 = vld [vmem:[#allocation2 + $0x58] sm:$0xff]  ;;  %p8351_p7 = por %p8350_p6, %p8349_p5 }
  0x4f   :  { %7877 = vmatprep.subr.bf16.mxu1 %v7876_v14  ;;  %v8531_v22 = vld [vmem:[#allocation7 + $0x30] sm:$0xff]  ;;  %v8533_v23 = vld [vmem:[#allocation7 + $0x28] sm:$0xff]  ;;  %v7884_v24 = vpack.c.bf16 %v8527_v21, %v8525_v20  ;;  %v8539_v25 = vld [vmem:[#allocation2 + $0x60] sm:$0xff] }
  0x50   :  { %7309 = vmatmul.mubr.msk.f32.vlgmr.msra.gmra.mrb[0].mxu0 %vm77_vm0, %v8509_v12  ;;  %v8541_v26 = vld [vmem:[#allocation2 + $0x68] sm:$0xff]  ;;  %v8543_v27 = vld [vmem:[#allocation2 + $0x70] sm:$0xff]  ;;  %v8547_v28 = vld [vmem:[#allocation7 + $0x38] sm:$0xff]  ;;  %p8352_p8 = pnand %p8351_p7, %p8345_p4 }
  0x51   :  { %7316 = vmatmul.mubr.msk.f32.vlgmr.msra.gmra.mrb[0].mxu1 %vm77_vm0, %v8515_v15  ;;  %7875 = vmatpush3.bf16.msra.mxu0 %v7872_v13  ;;  %v8549_v29 = vld [vmem:[#allocation2 + $0x78] sm:$0xff]  ;;  %v8553_v30 = vld [vmem:[#allocation7 + $0x40] sm:$0xff]  ;;  %v7888_v31 = vpack.c.bf16 %v8541_v26, %v8539_v25  ;;  %v8559_v32 = vld [vmem:[#allocation7 + $0x50] sm:$0xff] }
  0x52   :  { %7879 = vmatpush3.bf16.msra.mxu1 %v7876_v14  ;;  %7322 = vmatprep.mubr.msk.f32.mxu0 %vm77_vm0, %v8521_v18  ;;  %v7892_v33 = vpack.c.bf16 %v8549_v29, %v8543_v27  ;;  %v128_v34 = vld [vmem:[#allocation8] sm:$0xff]  ;;  %v129_v35 = vld [vmem:[#allocation8 + $0x8] sm:$0xff]  ;;  %v130_v37 = vld [vmem:[#allocation8 + $0x10] sm:$0xff] }
  0x53   :  { %7329 = vmatprep.mubr.msk.f32.mxu1 %vm77_vm0, %v8531_v22  ;;  %7881 = vmatprep.subr.bf16.mxu0 %v7880_v19  ;;  %v8565_v36 = vld [vmem:[#allocation7 + $0x48] sm:$0xff]  ;;  %v131_v38 = vld [vmem:[#allocation8 + $0x18] sm:$0xff]  ;;  %v8573_v40 = vld [vmem:[#allocation7 + $0x60] sm:$0xff]  ;;  %v8575_v41 = vpack.c.bf16 %v129_v35, %v128_v34 }
  0x54   :  { %7323 = vmatmul.mubr.msk.f32.vlgmr.msra.gmra.mrb[2].mxu0 %vm77_vm0, %v8533_v23  ;;  %7885 = vmatprep.subr.bf16.mxu1 %v7884_v24  ;;  %v8569_v39 = vld [vmem:[#allocation7 + $0x58] sm:$0xff]  ;;  %v8579_v42 = vld [vmem:[#allocation7 + $0x70] sm:$0xff]  ;;  %v8581_v43 = vpack.c.bf16 %v131_v38, %v130_v37  ;;  %v8585_v44 = vld [vmem:[#allocation7 + $0x68] sm:$0xff] }
  0x55   :  { %7330 = vmatmul.mubr.msk.f32.vlgmr.msra.gmra.mrb[2].mxu1 %vm77_vm0, %v8547_v28  ;;  %7883 = vmatpush3.bf16.msra.mxu0 %v7880_v19  ;;  %v8589_v45 = vld [vmem:[#allocation7 + $0x78] sm:$0xff]  ;;  %v132_v46 = vld [vmem:[#allocation8 + $0x20] sm:$0xff]  ;;  %v133_v47 = vld [vmem:[#allocation8 + $0x28] sm:$0xff] }
  0x56   :  { %7887 = vmatpush3.bf16.msra.mxu1 %v7884_v24  ;;  %7336 = vmatprep.mubr.msk.f32.mxu0 %vm77_vm0, %v8553_v30  ;;  %v134_v48 = vld [vmem:[#allocation8 + $0x30] sm:$0xff]  ;;  %v8601_v49 = vpack.c.bf16 %v133_v47, %v132_v46  ;;  %v135_v50 = vld [vmem:[#allocation8 + $0x38] sm:$0xff]  ;;  %v136_v52 = vld [vmem:[#allocation8 + $0x40] sm:$0xff] }
  0x57   :  { %7343 = vmatprep.mubr.msk.f32.mxu1 %vm77_vm0, %v8559_v32  ;;  %7889 = vmatprep.subr.bf16.mxu0 %v7888_v31  ;;  %v8603_v51 = vpack.c.bf16 %v135_v50, %v134_v48  ;;  %v137_v53 = vld [vmem:[#allocation8 + $0x48] sm:$0xff]  ;;  %v138_v54 = vld [vmem:[#allocation8 + $0x50] sm:$0xff]  ;;  %v139_v55 = vld [vmem:[#allocation8 + $0x58] sm:$0xff] }
  0x58   :  { %7337 = vmatmul.mubr.msk.f32.vlgmr.msra.gmra.mrb[4].mxu0 %vm77_vm0, %v8565_v36  ;;  %7893 = vmatprep.subr.bf16.mxu1 %v7892_v33  ;;  %v8607_v59 = vpack.c.bf16 %v137_v53, %v136_v52  ;;  %v8610_v61 = vpack.c.bf16 %v139_v55, %v138_v54  ;;  %v140_v62 = vld [vmem:[#allocation8 + $0x60] sm:$0xff]  ;;  %v141_v63 = vld [vmem:[#allocation8 + $0x68] sm:$0xff]  ;;  %v142_v3 = vld [vmem:[#allocation8 + $0x70] sm:$0xff] }
  0x59   :  { %7344 = vmatmul.mubr.msk.f32.vlgmr.msra.gmra.mrb[4].mxu1 %vm77_vm0, %v8569_v39  ;;  %7891 = vmatpush3.bf16.msra.mxu0 %v7888_v31  ;;  %v143_v7 = vld [vmem:[#allocation8 + $0x78] sm:$0xff]  ;;  %v8618_v24 = vpack.c.bf16 %v141_v63, %v140_v62  ;;  %v8624_v34 = vld [vmem:[#allocation5] sm:$0xff]  ;;  %v8626_v35 = vld [vmem:[#allocation5 + $0x8] sm:$0xff] }
  0x5a   :  { %7895 = vmatpush3.bf16.msra.mxu1 %v7892_v33  ;;  %7350 = vmatprep.mubr.msk.f32.mxu0 %vm77_vm0, %v8573_v40  ;;  %9653 = vst [vmem:[#allocation15_spill] sm:$0xff] %v8607_v59  ;;  %9654 = vst [vmem:[#allocation16_spill] sm:$0xff] %v8610_v61  ;;  %v8622_v33 = vpack.c.bf16 %v143_v7, %v142_v3  ;;  %v8630_v37 = vld [vmem:[#allocation5 + $0x10] sm:$0xff]  ;;  %v8632_v38 = vld [vmem:[#allocation5 + $0x18] sm:$0xff]  ;;  %v7928_v50 = vpack.c.bf16 %v8626_v35, %v8624_v34 }
  0x5b   :  { %7357 = vmatprep.mubr.msk.f32.mxu1 %vm77_vm0, %v8579_v42  ;;  %7897 = vmatprep.subr.bf16.mxu0 %v8575_v41  ;;  %9655 = vst [vmem:[#allocation17_spill] sm:$0xff] %v8624_v34  ;;  %9656 = vst [vmem:[#allocation18_spill] sm:$0xff] %v8626_v35  ;;  %v7932_v53 = vpack.c.bf16 %v8632_v38, %v8630_v37  ;;  %v8646_v54 = vld [vmem:[#allocation5 + $0x20] sm:$0xff]  ;;  %v8648_v55 = vld [vmem:[#allocation5 + $0x28] sm:$0xff]  ;;  %v2689_v34 = vmul.f32 %v8481_v0, %v8481_v0 }
  0x5c   :  { %7351 = vmatmul.mubr.msk.f32.vlgmr.msra.gmra.mrb[6].mxu0 %vm77_vm0, %v8585_v44  ;;  %7901 = vmatprep.subr.bf16.mxu1 %v8581_v43  ;;  %9657 = vst [vmem:[#allocation19_spill] sm:$0xff] %v8630_v37  ;;  %9658 = vst [vmem:[#allocation20_spill] sm:$0xff] %v8632_v38  ;;  %v7936_v3 = vpack.c.bf16 %v8648_v55, %v8646_v54 }
  0x5d   :  { %7358 = vmatmul.mubr.msk.f32.vlgmr.msra.gmra.mrb[6].mxu1 %vm77_vm0, %v8589_v45  ;;  %7899 = vmatpush3.bf16.msra.mxu0 %v8575_v41  ;;  %9659 = vst [vmem:[#allocation21_spill] sm:$0xff] %v8646_v54  ;;  %9660 = vst [vmem:[#allocation22_spill] sm:$0xff] %v8648_v55 }
  0x5e   :  { %7903 = vmatpush3.bf16.msra.mxu1 %v8581_v43  ;;  %7905 = vmatprep.subr.bf16.mxu0 %v8601_v49 }
  0x5f   :  { %7909 = vmatprep.subr.bf16.mxu1 %v8603_v51 }
 0x123   :  { %v7310_v56 = vpop.f32.mrb[0].mxu0 }
 0x124   :  { %v7317_v57 = vpop.f32.mrb[0].mxu1  ;;  %v217_v58 = vpop.f32.mrb[1].mxu0 }
 0x125   :  { %v298_v60 = vpop.f32.mrb[1].mxu1  ;;  %7364 = vmatprep.mubr.msk.f32.mxu0 %vm77_vm0, %v217_v58  ;;  %v8654_v58 = vld [vmem:[#allocation5 + $0x38] sm:$0xff] }
 0x126   :  { %7371 = vmatprep.mubr.msk.f32.mxu1 %vm77_vm0, %v298_v60  ;;  %7365 = vmatmul.mubr.msk.f32.vlgmr.msra.gmra.mrb[8].mxu0 %vm77_vm0, %v7310_v56  ;;  %9662 = vst [vmem:[#allocation24_spill] sm:$0xff] %v8654_v58 }
 0x127   :  { %7372 = vmatmul.mubr.msk.f32.vlgmr.msra.gmra.mrb[8].mxu1 %vm77_vm0, %v7317_v57  ;;  %v7324_v13 = vpop.f32.mrb[2].mxu0  ;;  %7907 = vmatpush3.bf16.msra.mxu0 %v8601_v49  ;;  %v8652_v57 = vld [vmem:[#allocation5 + $0x30] sm:$0xff] }
 0x128   :  { %v7331_v14 = vpop.f32.mrb[2].mxu1  ;;  %7911 = vmatpush3.bf16.msra.mxu1 %v8603_v51  ;;  %v379_v19 = vpop.f32.mrb[3].mxu0  ;;  %7913 = vmatprep.subr.bf16.mxu0 %v8607_v59  ;;  %9661 = vst [vmem:[#allocation23_spill] sm:$0xff] %v8652_v57  ;;  %v7940_v7 = vpack.c.bf16 %v8654_v58, %v8652_v57 }
 0x129   :  { %v460_v31 = vpop.f32.mrb[3].mxu1  ;;  %7378 = vmatprep.mubr.msk.f32.mxu0 %vm77_vm0, %v379_v19  ;;  %7917 = vmatprep.subr.bf16.mxu1 %v8610_v61  ;;  %v8669_v19 = vld [vmem:[#allocation5 + $0x50] sm:$0xff] }
 0x12a   :  { %7385 = vmatprep.mubr.msk.f32.mxu1 %vm77_vm0, %v460_v31  ;;  %7379 = vmatmul.mubr.msk.f32.vlgmr.msra.gmra.mrb[10].mxu0 %vm77_vm0, %v7324_v13  ;;  %v8664_v13 = vld [vmem:[#allocation5 + $0x40] sm:$0xff]  ;;  %9665 = vst [vmem:[#allocation27_spill] sm:$0xff] %v8669_v19  ;;  %v8671_v31 = vld [vmem:[#allocation5 + $0x58] sm:$0xff] }
 0x12b   :  { %7386 = vmatmul.mubr.msk.f32.vlgmr.msra.gmra.mrb[10].mxu1 %vm77_vm0, %v7331_v14  ;;  %v7338_v46 = vpop.f32.mrb[4].mxu0  ;;  %7915 = vmatpush3.bf16.msra.mxu0 %v8607_v59  ;;  %9663 = vst [vmem:[#allocation25_spill] sm:$0xff] %v8664_v13  ;;  %v8666_v14 = vld [vmem:[#allocation5 + $0x48] sm:$0xff]  ;;  %9666 = vst [vmem:[#allocation28_spill] sm:$0xff] %v8671_v31 }
 0x12c   :  { %v7345_v47 = vpop.f32.mrb[4].mxu1  ;;  %7919 = vmatpush3.bf16.msra.mxu1 %v8610_v61  ;;  %v541_v48 = vpop.f32.mrb[5].mxu0  ;;  %7921 = vmatprep.subr.bf16.mxu0 %v8618_v24  ;;  %9664 = vst [vmem:[#allocation26_spill] sm:$0xff] %v8666_v14 }
 0x12d   :  { %v622_v52 = vpop.f32.mrb[5].mxu1  ;;  %7392 = vmatprep.mubr.msk.f32.mxu0 %vm77_vm0, %v541_v48  ;;  %7925 = vmatprep.subr.bf16.mxu1 %v8622_v33  ;;  %v8683_v48 = vld [vmem:[#allocation5 + $0x60] sm:$0xff] }
 0x12e   :  { %7399 = vmatprep.mubr.msk.f32.mxu1 %vm77_vm0, %v622_v52  ;;  %7393 = vmatmul.mubr.msk.f32.vlgmr.msra.gmra.mrb[12].mxu0 %vm77_vm0, %v7338_v46  ;;  %v7944_v46 = vpack.c.bf16 %v8666_v14, %v8664_v13  ;;  %9667 = vst [vmem:[#allocation29_spill] sm:$0xff] %v8683_v48  ;;  %v8689_v52 = vld [vmem:[#allocation5 + $0x70] sm:$0xff] }
 0x12f   :  { %7400 = vmatmul.mubr.msk.f32.vlgmr.msra.gmra.mrb[12].mxu1 %vm77_vm0, %v7345_v47  ;;  %v7352_v56 = vpop.f32.mrb[6].mxu0  ;;  %7923 = vmatpush3.bf16.msra.mxu0 %v8618_v24  ;;  %v7948_v47 = vpack.c.bf16 %v8671_v31, %v8669_v19  ;;  %9669 = vst [vmem:[#allocation31_spill] sm:$0xff] %v8689_v52 }
 0x130   :  { %v7359_v60 = vpop.f32.mrb[6].mxu1  ;;  %7927 = vmatpush3.bf16.msra.mxu1 %v8622_v33  ;;  %v703_v62 = vpop.f32.mrb[7].mxu0  ;;  %7929 = vmatprep.subr.bf16.mxu0 %v7928_v50 }
 0x131   :  { %v784_v63 = vpop.f32.mrb[7].mxu1  ;;  %7406 = vmatprep.mubr.msk.f32.mxu0 %vm77_vm0, %v703_v62  ;;  %7933 = vmatprep.subr.bf16.mxu1 %v7932_v53 }
 0x132   :  { %7413 = vmatprep.mubr.msk.f32.mxu1 %vm77_vm0, %v784_v63  ;;  %7407 = vmatmul.mubr.msk.f32.vlgmr.msra.gmra.mrb[14].mxu0 %vm77_vm0, %v7352_v56 }
 0x133   :  { %7414 = vmatmul.mubr.msk.f32.vlgmr.msra.gmra.mrb[14].mxu1 %vm77_vm0, %v7359_v60  ;;  %7931 = vmatpush3.bf16.msra.mxu0 %v7928_v50  ;;  %v8685_v50 = vld [vmem:[#allocation5 + $0x68] sm:$0xff] }
 0x134   :  { %7935 = vmatpush3.bf16.msra.mxu1 %v7932_v53  ;;  %7420 = vmatprep.mubr.msk.f32.mxu0 %vm77_vm0, %v8491_v5  ;;  %9668 = vst [vmem:[#allocation30_spill] sm:$0xff] %v8685_v50  ;;  %v8691_v53 = vld [vmem:[#allocation5 + $0x78] sm:$0xff]  ;;  %v7952_v56 = vpack.c.bf16 %v8685_v50, %v8683_v48 }
 0x135   :  { %7427 = vmatprep.mubr.msk.f32.mxu1 %vm77_vm0, %v8493_v6  ;;  %7937 = vmatprep.subr.bf16.mxu0 %v7936_v3  ;;  %9670 = vst [vmem:[#allocation32_spill] sm:$0xff] %v8691_v53  ;;  %v7956_v60 = vpack.c.bf16 %v8691_v53, %v8689_v52 }
 0x136   :  { %7421 = vmatmul.mubr.msk.f32.vlgmr.msra.gmra.mrb[16].mxu0 %vm77_vm0, %v8509_v12  ;;  %7941 = vmatprep.subr.bf16.mxu1 %v7940_v7 }
 0x137   :  { %7428 = vmatmul.mubr.msk.f32.vlgmr.msra.gmra.mrb[16].mxu1 %vm77_vm0, %v8515_v15  ;;  %7939 = vmatpush3.bf16.msra.mxu0 %v7936_v3 }
 0x138   :  { %7943 = vmatpush3.bf16.msra.mxu1 %v7940_v7  ;;  %7434 = vmatprep.mubr.msk.f32.mxu0 %vm77_vm0, %v8521_v18 }
 0x139   :  { %7441 = vmatprep.mubr.msk.f32.mxu1 %vm77_vm0, %v8531_v22  ;;  %7945 = vmatprep.subr.bf16.mxu0 %v7944_v46 }
 0x13a   :  { %7435 = vmatmul.mubr.msk.f32.vlgmr.msra.gmra.mrb[18].mxu0 %vm77_vm0, %v8533_v23  ;;  %7949 = vmatprep.subr.bf16.mxu1 %v7948_v47 }
 0x13b   :  { %7442 = vmatmul.mubr.msk.f32.vlgmr.msra.gmra.mrb[18].mxu1 %vm77_vm0, %v8547_v28  ;;  %7947 = vmatpush3.bf16.msra.mxu0 %v7944_v46 }
 0x13c   :  { %7951 = vmatpush3.bf16.msra.mxu1 %v7948_v47  ;;  %7448 = vmatprep.mubr.msk.f32.mxu0 %vm77_vm0, %v8553_v30 }
 0x13d   :  { %7455 = vmatprep.mubr.msk.f32.mxu1 %vm77_vm0, %v8559_v32  ;;  %7953 = vmatprep.subr.bf16.mxu0 %v7952_v56 }
 0x13e   :  { %7449 = vmatmul.mubr.msk.f32.vlgmr.msra.gmra.mrb[20].mxu0 %vm77_vm0, %v8565_v36  ;;  %7957 = vmatprep.subr.bf16.mxu1 %v7956_v60 }
 0x13f   :  { %7456 = vmatmul.mubr.msk.f32.vlgmr.msra.gmra.mrb[20].mxu1 %vm77_vm0, %v8569_v39  ;;  %7955 = vmatpush3.bf16.msra.mxu0 %v7952_v56 }
 0x140   :  { %7959 = vmatpush3.bf16.msra.mxu1 %v7956_v60  ;;  %7462 = vmatprep.mubr.msk.f32.mxu0 %vm77_vm0, %v8573_v40 }
 0x141   :  { %7469 = vmatprep.mubr.msk.f32.mxu1 %vm77_vm0, %v8579_v42  ;;  %7961 = vmatprep.subr.bf16.mxu0 %v8575_v41 }
 0x142   :  { %7463 = vmatmul.mubr.msk.f32.vlgmr.msra.gmra.mrb[22].mxu0 %vm77_vm0, %v8585_v44  ;;  %7965 = vmatprep.subr.bf16.mxu1 %v8581_v43 }
 0x143   :  { %7470 = vmatmul.mubr.msk.f32.vlgmr.msra.gmra.mrb[22].mxu1 %vm77_vm0, %v8589_v45  ;;  %7963 = vmatpush3.bf16.msra.mxu0 %v8575_v41 }
 0x144   :  { %7967 = vmatpush3.bf16.msra.mxu1 %v8581_v43  ;;  %7969 = vmatprep.subr.bf16.mxu0 %v8601_v49 }
 0x145   :  { %7973 = vmatprep.subr.bf16.mxu1 %v8603_v51 }
 0x1f9   :  { %v8727_v62 = vpop.f32.mrb[8].mxu0 }
 0x1fa   :  { %v8729_v63 = vpop.f32.mrb[8].mxu1  ;;  %v8731_v3 = vpop.f32.mrb[9].mxu0 }
 0x1fb   :  { %v8733_v7 = vpop.f32.mrb[9].mxu1 }
 0x1fd   :  { %v8735_v46 = vpop.f32.mrb[10].mxu0 }
 0x1fe   :  { %v8737_v47 = vpop.f32.mrb[10].mxu1  ;;  %v8739_v56 = vpop.f32.mrb[11].mxu0 }
 0x1ff   :  { %v8741_v60 = vpop.f32.mrb[11].mxu1 }
 0x201   :  { %v8743_v53 = vpop.f32.mrb[12].mxu0 }
 0x202   :  { %v8745_v52 = vpop.f32.mrb[12].mxu1  ;;  %v8747_v50 = vpop.f32.mrb[13].mxu0 }
 0x203   :  { %v8749_v48 = vpop.f32.mrb[13].mxu1 }
 0x205   :  { %v8751_v31 = vpop.f32.mrb[14].mxu0 }
 0x206   :  { %v8753_v19 = vpop.f32.mrb[14].mxu1  ;;  %v8755_v14 = vpop.f32.mrb[15].mxu0 }
 0x207   :  { %v8757_v13 = vpop.f32.mrb[15].mxu1 }
 0x208   :  { %9671 = vst [vmem:[#allocation33_spill] sm:$0xff] %v8757_v13 }
 0x209   :  { %v7422_v58 = vpop.f32.mrb[16].mxu0 }
 0x20a   :  { %v7429_v57 = vpop.f32.mrb[16].mxu1  ;;  %v1507_v55 = vpop.f32.mrb[17].mxu0 }
 0x20b   :  { %v1582_v54 = vpop.f32.mrb[17].mxu1  ;;  %7476 = vmatprep.mubr.msk.f32.mxu0 %vm77_vm0, %v1507_v55  ;;  %v2690_v55 = vmul.f32 %v8483_v1, %v8483_v1 }
 0x20c   :  { %7483 = vmatprep.mubr.msk.f32.mxu1 %vm77_vm0, %v1582_v54  ;;  %7477 = vmatmul.mubr.msk.f32.vlgmr.msra.gmra.mrb[24].mxu0 %vm77_vm0, %v7422_v58  ;;  %v2692_v58 = vmul.f32 %v8489_v4, %v8489_v4 }
 0x20d   :  { %7484 = vmatmul.mubr.msk.f32.vlgmr.msra.gmra.mrb[24].mxu1 %vm77_vm0, %v7429_v57  ;;  %v7436_v38 = vpop.f32.mrb[18].mxu0  ;;  %7971 = vmatpush3.bf16.msra.mxu0 %v8601_v49  ;;  %v2691_v57 = vmul.f32 %v8485_v2, %v8485_v2  ;;  %v7992_v13 = vpack.c.bf16 %v2690_v55, %v2689_v34  ;;  %v2696_v34 = vmul.f32 %v8507_v11, %v8507_v11 }
 0x20e   :  { %v7443_v37 = vpop.f32.mrb[18].mxu1  ;;  %7975 = vmatpush3.bf16.msra.mxu1 %v8603_v51  ;;  %v1657_v35 = vpop.f32.mrb[19].mxu0  ;;  %7977 = vmatprep.subr.bf16.mxu0 %v8607_v59  ;;  %v2698_v11 = vmul.f32 %v8519_v17, %v8519_v17  ;;  %v2701_v17 = vmul.f32 %v8539_v25, %v8539_v25 }
 0x20f   :  { %v1732_v54 = vpop.f32.mrb[19].mxu1  ;;  %7490 = vmatprep.mubr.msk.f32.mxu0 %vm77_vm0, %v1657_v35  ;;  %7981 = vmatprep.subr.bf16.mxu1 %v8610_v61  ;;  %v7996_v4 = vpack.c.bf16 %v2692_v58, %v2691_v57 }
 0x210   :  { %7497 = vmatprep.mubr.msk.f32.mxu1 %vm77_vm0, %v1732_v54  ;;  %7491 = vmatmul.mubr.msk.f32.vlgmr.msra.gmra.mrb[26].mxu0 %vm77_vm0, %v7436_v38  ;;  %v2693_v38 = vmul.f32 %v8501_v8, %v8501_v8  ;;  %v2695_v54 = vmul.f32 %v8505_v10, %v8505_v10  ;;  %v2697_v10 = vmul.f32 %v8517_v16, %v8517_v16 }
 0x211   :  { %7498 = vmatmul.mubr.msk.f32.vlgmr.msra.gmra.mrb[26].mxu1 %vm77_vm0, %v7443_v37  ;;  %v7450_v0 = vpop.f32.mrb[20].mxu0  ;;  %7979 = vmatpush3.bf16.msra.mxu0 %v8607_v59  ;;  %v2694_v37 = vmul.f32 %v8503_v9, %v8503_v9 }
 0x212   :  { %v7457_v1 = vpop.f32.mrb[20].mxu1  ;;  %7983 = vmatpush3.bf16.msra.mxu1 %v8610_v61  ;;  %v1807_v35 = vpop.f32.mrb[21].mxu0  ;;  %7985 = vmatprep.subr.bf16.mxu0 %v8618_v24  ;;  %v8008_v16 = vpack.c.bf16 %v2698_v11, %v2697_v10  ;;  %v8884_v11 = vmul.f32 %v8733_v7, %v8733_v7 }
 0x213   :  { %v1882_v2 = vpop.f32.mrb[21].mxu1  ;;  %7504 = vmatprep.mubr.msk.f32.mxu0 %vm77_vm0, %v1807_v35  ;;  %7989 = vmatprep.subr.bf16.mxu1 %v8622_v33  ;;  %v8000_v58 = vpack.c.bf16 %v2694_v37, %v2693_v38  ;;  %v2700_v35 = vmul.f32 %v8527_v21, %v8527_v21  ;;  %v8865_v38 = vmul.f32 %v8731_v3, %v8731_v3 }
 0x214   :  { %7511 = vmatprep.mubr.msk.f32.mxu1 %vm77_vm0, %v1882_v2  ;;  %7505 = vmatmul.mubr.msk.f32.vlgmr.msra.gmra.mrb[28].mxu0 %vm77_vm0, %v7450_v0  ;;  %v8004_v0 = vpack.c.bf16 %v2696_v34, %v2695_v54  ;;  %v2704_v2 = vmul.f32 %v8549_v29, %v8549_v29 }
 0x215   :  { %7512 = vmatmul.mubr.msk.f32.vlgmr.msra.gmra.mrb[28].mxu1 %vm77_vm0, %v7457_v1  ;;  %v7464_v55 = vpop.f32.mrb[22].mxu0  ;;  %7987 = vmatpush3.bf16.msra.mxu0 %v8618_v24  ;;  %v2699_v1 = vmul.f32 %v8525_v20, %v8525_v20  ;;  %v2702_v20 = vmul.f32 %v8541_v26, %v8541_v26 }
 0x216   :  { %v7471_v57 = vpop.f32.mrb[22].mxu1  ;;  %7991 = vmatpush3.bf16.msra.mxu1 %v8622_v33  ;;  %v1957_v8 = vpop.f32.mrb[23].mxu0  ;;  %7993 = vmatprep.subr.bf16.mxu0 %v7992_v13 }
 0x217   :  { %v2032_v9 = vpop.f32.mrb[23].mxu1  ;;  %7518 = vmatprep.mubr.msk.f32.mxu0 %vm77_vm0, %v1957_v8  ;;  %7997 = vmatprep.subr.bf16.mxu1 %v7996_v4  ;;  %v8012_v21 = vpack.c.bf16 %v2700_v35, %v2699_v1  ;;  %v8016_v25 = vpack.c.bf16 %v2702_v20, %v2701_v17  ;;  %v8909_v20 = vmul.f32 %v8735_v46, %v8735_v46 }
 0x218   :  { %7525 = vmatprep.mubr.msk.f32.mxu1 %vm77_vm0, %v2032_v9  ;;  %7519 = vmatmul.mubr.msk.f32.vlgmr.msra.gmra.mrb[30].mxu0 %vm77_vm0, %v7464_v55 }
 0x219   :  { %7526 = vmatmul.mubr.msk.f32.vlgmr.msra.gmra.mrb[30].mxu1 %vm77_vm0, %v7471_v57  ;;  %7995 = vmatpush3.bf16.msra.mxu0 %v7992_v13  ;;  %v2703_v13 = vmul.f32 %v8543_v27, %v8543_v27  ;;  %v8857_v27 = vmul.f32 %v8727_v62, %v8727_v62 }
 0x21a   :  { %7999 = vmatpush3.bf16.msra.mxu1 %v7996_v4  ;;  %7532 = vmatprep.mubr.msk.f32.mxu0 %vm77_vm0, %v8491_v5  ;;  %v8861_v4 = vmul.f32 %v8729_v63, %v8729_v63 }
 0x21b   :  { %7539 = vmatprep.mubr.msk.f32.mxu1 %vm77_vm0, %v8493_v6  ;;  %8001 = vmatprep.subr.bf16.mxu0 %v8000_v58  ;;  %v8020_v26 = vpack.c.bf16 %v2704_v2, %v2703_v13  ;;  %v8922_v2 = vmul.f32 %v8739_v56, %v8739_v56 }
 0x21c   :  { %7533 = vmatmul.mubr.msk.f32.vlgmr.msra.gmra.mrb[32].mxu0 %vm77_vm0, %v8509_v12  ;;  %8005 = vmatprep.subr.bf16.mxu1 %v8004_v0 }
 0x21d   :  { %7540 = vmatmul.mubr.msk.f32.vlgmr.msra.gmra.mrb[32].mxu1 %vm77_vm0, %v8515_v15  ;;  %8003 = vmatpush3.bf16.msra.mxu0 %v8000_v58 }
 0x21e   :  { %8007 = vmatpush3.bf16.msra.mxu1 %v8004_v0  ;;  %7546 = vmatprep.mubr.msk.f32.mxu0 %vm77_vm0, %v8521_v18 }
 0x21f   :  { %7553 = vmatprep.mubr.msk.f32.mxu1 %vm77_vm0, %v8531_v22  ;;  %8009 = vmatprep.subr.bf16.mxu0 %v8008_v16 }
 0x220   :  { %7547 = vmatmul.mubr.msk.f32.vlgmr.msra.gmra.mrb[34].mxu0 %vm77_vm0, %v8533_v23  ;;  %8013 = vmatprep.subr.bf16.mxu1 %v8012_v21 }
 0x221   :  { %7554 = vmatmul.mubr.msk.f32.vlgmr.msra.gmra.mrb[34].mxu1 %vm77_vm0, %v8547_v28  ;;  %8011 = vmatpush3.bf16.msra.mxu0 %v8008_v16 }
 0x222   :  { %8015 = vmatpush3.bf16.msra.mxu1 %v8012_v21  ;;  %7560 = vmatprep.mubr.msk.f32.mxu0 %vm77_vm0, %v8553_v30  ;;  %v8915_v21 = vmul.f32 %v8737_v47, %v8737_v47 }
 0x223   :  { %7567 = vmatprep.mubr.msk.f32.mxu1 %vm77_vm0, %v8559_v32  ;;  %8017 = vmatprep.subr.bf16.mxu0 %v8016_v25 }
 0x224   :  { %7561 = vmatmul.mubr.msk.f32.vlgmr.msra.gmra.mrb[36].mxu0 %vm77_vm0, %v8565_v36  ;;  %8021 = vmatprep.subr.bf16.mxu1 %v8020_v26 }
 0x225   :  { %7568 = vmatmul.mubr.msk.f32.vlgmr.msra.gmra.mrb[36].mxu1 %vm77_vm0, %v8569_v39  ;;  %8019 = vmatpush3.bf16.msra.mxu0 %v8016_v25 }
 0x226   :  { %8023 = vmatpush3.bf16.msra.mxu1 %v8020_v26  ;;  %7574 = vmatprep.mubr.msk.f32.mxu0 %vm77_vm0, %v8573_v40 }
 0x227   :  { %7581 = vmatprep.mubr.msk.f32.mxu1 %vm77_vm0, %v8579_v42  ;;  %8025 = vmatprep.subr.bf16.mxu0 %v8575_v41 }
 0x228   :  { %7575 = vmatmul.mubr.msk.f32.vlgmr.msra.gmra.mrb[38].mxu0 %vm77_vm0, %v8585_v44  ;;  %8029 = vmatprep.subr.bf16.mxu1 %v8581_v43 }
 0x229   :  { %7582 = vmatmul.mubr.msk.f32.vlgmr.msra.gmra.mrb[38].mxu1 %vm77_vm0, %v8589_v45  ;;  %8027 = vmatpush3.bf16.msra.mxu0 %v8575_v41 }
 0x22a   :  { %8031 = vmatpush3.bf16.msra.mxu1 %v8581_v43  ;;  %8033 = vmatprep.subr.bf16.mxu0 %v8601_v49 }
 0x22b   :  { %8037 = vmatprep.subr.bf16.mxu1 %v8603_v51 }
 0x2df   :  { %v7478_v29 = vpop.f32.mrb[24].mxu0 }
 0x2e0   :  { %v8867_v37 = vmul.f32 %v7478_v29, %v7478_v29  ;;  %v8870_v54 = vmul.f32 %v7478_v29, %v8727_v62  ;;  %v7485_v34 = vpop.f32.mrb[24].mxu1  ;;  %v2113_v55 = vpop.f32.mrb[25].mxu0 }
 0x2e1   :  { %v8872_v57 = vmul.f32 %v7485_v34, %v7485_v34  ;;  %v8875_v8 = vmul.f32 %v7485_v34, %v8729_v63  ;;  %v8877_v9 = vmul.f32 %v2113_v55, %v2113_v55  ;;  %v8880_v58 = vmul.f32 %v2113_v55, %v8731_v3  ;;  %v2194_v10 = vpop.f32.mrb[25].mxu1 }
 0x2e2   :  { %9672 = vst [vmem:[#allocation34_spill] sm:$0xff] %v8867_v37  ;;  %9673 = vst [vmem:[#allocation35_spill] sm:$0xff] %v8870_v54  ;;  %v8888_v62 = vadd.f32 %v8867_v37, %v8857_v27  ;;  %v8890_v0 = vmul.f32 %v2194_v10, %v2194_v10  ;;  %v8893_v1 = vmul.f32 %v2194_v10, %v8733_v7 }
 0x2e3   :  { %9674 = vst [vmem:[#allocation36_spill] sm:$0xff] %v8872_v57  ;;  %9675 = vst [vmem:[#allocation37_spill] sm:$0xff] %v8875_v8  ;;  %v8897_v63 = vadd.f32 %v8872_v57, %v8861_v4  ;;  %v8901_v3 = vadd.f32 %v8877_v9, %v8865_v38  ;;  %v7492_v35 = vpop.f32.mrb[26].mxu0  ;;  %v8935_v10 = vmul.f32 %v8741_v60, %v8741_v60  ;;  %v9729_v57 = vld [vmem:[#allocation24_spill] sm:$0xff] }
 0x2e4   :  { %9676 = vst [vmem:[#allocation38_spill] sm:$0xff] %v8877_v9  ;;  %9677 = vst [vmem:[#allocation39_spill] sm:$0xff] %v8880_v58  ;;  %v8905_v16 = vadd.f32 %v8890_v0, %v8884_v11  ;;  %v7499_v17 = vpop.f32.mrb[26].mxu1  ;;  %v8911_v7 = vmul.f32 %v7492_v35, %v7492_v35  ;;  %v8918_v13 = vmul.f32 %v7492_v35, %v8735_v46  ;;  %v2275_v34 = vpop.f32.mrb[27].mxu0 }
 0x2e5   :  { %9678 = vst [vmem:[#allocation40_spill] sm:$0xff] %v8888_v62  ;;  %9679 = vst [vmem:[#allocation41_spill] sm:$0xff] %v8890_v0  ;;  %v8928_v26 = vmul.f32 %v7499_v17, %v7499_v17  ;;  %v8931_v29 = vmul.f32 %v7499_v17, %v8737_v47  ;;  %v2356_v55 = vpop.f32.mrb[27].mxu1  ;;  %v8937_v46 = vmul.f32 %v2275_v34, %v2275_v34 }
 0x2e6   :  { %9680 = vst [vmem:[#allocation42_spill] sm:$0xff] %v8893_v1  ;;  %9681 = vst [vmem:[#allocation43_spill] sm:$0xff] %v8897_v63  ;;  %v8926_v25 = vadd.f32 %v8911_v7, %v8909_v20  ;;  %v8940_v35 = vmul.f32 %v2275_v34, %v8739_v56  ;;  %v8949_v47 = vmul.f32 %v2356_v55, %v8741_v60  ;;  %v9728_v63 = vld [vmem:[#allocation23_spill] sm:$0xff] }
 0x2e7   :  { %9682 = vst [vmem:[#allocation44_spill] sm:$0xff] %v8901_v3  ;;  %9683 = vst [vmem:[#allocation45_spill] sm:$0xff] %v8905_v16  ;;  %v7506_v1 = vpop.f32.mrb[28].mxu0  ;;  %v8946_v8 = vadd.f32 %v8928_v26, %v8915_v21  ;;  %v8953_v54 = vadd.f32 %v8937_v46, %v8922_v2  ;;  %v8961_v34 = vmul.f32 %v8743_v53, %v8743_v53 }
 0x2e8   :  { %9684 = vst [vmem:[#allocation46_spill] sm:$0xff] %v8911_v7  ;;  %9685 = vst [vmem:[#allocation47_spill] sm:$0xff] %v8918_v13  ;;  %v8942_v13 = vmul.f32 %v2356_v55, %v2356_v55  ;;  %v7513_v58 = vpop.f32.mrb[28].mxu1  ;;  %v2437_v17 = vpop.f32.mrb[29].mxu0  ;;  %v8967_v60 = vmul.f32 %v8745_v52, %v8745_v52  ;;  %v8970_v55 = vmul.f32 %v7506_v1, %v8743_v53 }
 0x2e9   :  { %9686 = vst [vmem:[#allocation48_spill] sm:$0xff] %v8926_v25  ;;  %9687 = vst [vmem:[#allocation49_spill] sm:$0xff] %v8928_v26  ;;  %v8989_v53 = vmul.f32 %v2437_v17, %v2437_v17  ;;  %v3959_v9 = vmul.f32 %v9728_v63, %v9728_v63  ;;  %v3960_v62 = vmul.f32 %v9729_v57, %v9729_v57  ;;  %v9732_v57 = vld [vmem:[#allocation27_spill] sm:$0xff] }
 0x2ea   :  { %9688 = vst [vmem:[#allocation50_spill] sm:$0xff] %v8931_v29  ;;  %9689 = vst [vmem:[#allocation51_spill] sm:$0xff] %v8937_v46  ;;  %v2518_v29 = vpop.f32.mrb[29].mxu1  ;;  %v8957_v56 = vadd.f32 %v8942_v13, %v8935_v10  ;;  %v3963_v63 = vmul.f32 %v9732_v57, %v9732_v57 }
 0x2eb   :  { %9690 = vst [vmem:[#allocation52_spill] sm:$0xff] %v8940_v35  ;;  %9691 = vst [vmem:[#allocation53_spill] sm:$0xff] %v8942_v13  ;;  %v8963_v35 = vmul.f32 %v7506_v1, %v7506_v1  ;;  %v7520_v26 = vpop.f32.mrb[30].mxu0  ;;  %v8983_v13 = vmul.f32 %v7513_v58, %v8745_v52  ;;  %v8992_v1 = vmul.f32 %v2437_v17, %v8747_v50 }
 0x2ec   :  { %9692 = vst [vmem:[#allocation54_spill] sm:$0xff] %v8946_v8  ;;  %9693 = vst [vmem:[#allocation55_spill] sm:$0xff] %v8949_v47  ;;  %v8974_v47 = vmul.f32 %v8747_v50, %v8747_v50  ;;  %v7527_v46 = vpop.f32.mrb[30].mxu1  ;;  %v2599_v7 = vpop.f32.mrb[31].mxu0  ;;  %v8987_v8 = vmul.f32 %v8749_v48, %v8749_v48  ;;  %v9001_v52 = vmul.f32 %v2518_v29, %v8749_v48 }
 0x2ed   :  { %9694 = vst [vmem:[#allocation56_spill] sm:$0xff] %v8953_v54  ;;  %9695 = vst [vmem:[#allocation57_spill] sm:$0xff] %v8957_v56  ;;  %v8978_v56 = vadd.f32 %v8963_v35, %v8961_v34  ;;  %v8980_v54 = vmul.f32 %v7513_v58, %v7513_v58  ;;  %v9019_v48 = vmul.f32 %v7520_v26, %v7520_v26 }
 0x2ee   :  { %9696 = vst [vmem:[#allocation58_spill] sm:$0xff] %v8963_v35  ;;  %9697 = vst [vmem:[#allocation59_spill] sm:$0xff] %v8970_v55  ;;  %v8994_v55 = vmul.f32 %v2518_v29, %v2518_v29  ;;  %v2680_v35 = vpop.f32.mrb[31].mxu1 }
 0x2ef   :  { %9698 = vst [vmem:[#allocation60_spill] sm:$0xff] %v8978_v56  ;;  %9699 = vst [vmem:[#allocation61_spill] sm:$0xff] %v8980_v54  ;;  %v8998_v56 = vadd.f32 %v8980_v54, %v8967_v60  ;;  %v7534_v58 = vpop.f32.mrb[32].mxu0  ;;  %v9042_v54 = vmul.f32 %v7527_v46, %v8753_v19 }
 0x2f0   :  { %9700 = vst [vmem:[#allocation62_spill] sm:$0xff] %v8983_v13  ;;  %9701 = vst [vmem:[#allocation63_spill] sm:$0xff] %v8989_v53  ;;  %v9005_v13 = vadd.f32 %v8989_v53, %v8974_v47  ;;  %v9009_v25 = vadd.f32 %v8994_v55, %v8987_v8  ;;  %v7541_v50 = vpop.f32.mrb[32].mxu1  ;;  %v2771_v17 = vpop.f32.mrb[33].mxu0 }
 0x2f1   :  { %9702 = vst [vmem:[#allocation64_spill] sm:$0xff] %v8992_v1  ;;  %9703 = vst [vmem:[#allocation65_spill] sm:$0xff] %v8994_v55  ;;  %v9013_v1 = vmul.f32 %v8751_v31, %v8751_v31  ;;  %v2846_v29 = vpop.f32.mrb[33].mxu1  ;;  %7588 = vmatprep.mubr.msk.f32.mxu0 %vm77_vm0, %v2771_v17  ;;  %v9039_v17 = vmul.f32 %v7527_v46, %v7527_v46 }
 0x2f2   :  { %9704 = vst [vmem:[#allocation66_spill] sm:$0xff] %v8998_v56  ;;  %9705 = vst [vmem:[#allocation67_spill] sm:$0xff] %v9001_v52  ;;  %v9017_v56 = vmul.f32 %v8753_v19, %v8753_v19  ;;  %v9024_v52 = vmul.f32 %v8755_v14, %v8755_v14  ;;  %7595 = vmatprep.mubr.msk.f32.mxu1 %vm77_vm0, %v2846_v29  ;;  %7589 = vmatmul.mubr.msk.f32.vlgmr.msra.gmra.mrb[40].mxu0 %vm77_vm0, %v7534_v58 }
 0x2f3   :  { %9706 = vst [vmem:[#allocation68_spill] sm:$0xff] %v9005_v13  ;;  %9707 = vst [vmem:[#allocation69_spill] sm:$0xff] %v9009_v25  ;;  %v9709_v25 = vld [vmem:[#allocation33_spill] sm:$0xff]  ;;  %v9031_v13 = vmul.f32 %v7520_v26, %v8751_v31  ;;  %v9037_v53 = vadd.f32 %v9019_v48, %v9013_v1  ;;  %7596 = vmatmul.mubr.msk.f32.vlgmr.msra.gmra.mrb[40].mxu1 %vm77_vm0, %v7541_v50  ;;  %v7548_v16 = vpop.f32.mrb[34].mxu0  ;;  %8035 = vmatpush3.bf16.msra.mxu0 %v8601_v49 }
 0x2f4   :  { %9708 = vst [vmem:[#allocation70_spill] sm:$0xff] %v9019_v48  ;;  %v9028_v55 = vmul.f32 %v9709_v25, %v9709_v25  ;;  %9713 = vst [vmem:[#allocation73_spill] sm:$0xff] %v9039_v17  ;;  %v9046_v31 = vmul.f32 %v2599_v7, %v2599_v7  ;;  %v9049_v26 = vmul.f32 %v2599_v7, %v8755_v14  ;;  %v7555_v29 = vpop.f32.mrb[34].mxu1  ;;  %8039 = vmatpush3.bf16.msra.mxu1 %v8603_v51  ;;  %v9720_v14 = vld [vmem:[#allocation17_spill] sm:$0xff] }
 0x2f5   :  { %9711 = vst [vmem:[#allocation71_spill] sm:$0xff] %v9031_v13  ;;  %9712 = vst [vmem:[#allocation72_spill] sm:$0xff] %v9037_v53  ;;  %v9051_v58 = vmul.f32 %v2680_v35, %v2680_v35  ;;  %v2921_v13 = vpop.f32.mrb[35].mxu0  ;;  %8041 = vmatprep.subr.bf16.mxu0 %v8607_v59  ;;  %v9057_v19 = vadd.f32 %v9039_v17, %v9017_v56  ;;  %v9060_v46 = vmul.f32 %v2680_v35, %v9709_v25  ;;  %v2996_v50 = vpop.f32.mrb[35].mxu1  ;;  %v9723_v25 = vld [vmem:[#allocation18_spill] sm:$0xff] }
 0x2f6   :  { %9710 = vst [vmem:[#allocation33_spill] sm:$0xff] %v9028_v55  ;;  %9714 = vst [vmem:[#allocation74_spill] sm:$0xff] %v9042_v54  ;;  %7602 = vmatprep.mubr.msk.f32.mxu0 %vm77_vm0, %v2921_v13  ;;  %8045 = vmatprep.subr.bf16.mxu1 %v8610_v61  ;;  %v3953_v7 = vmul.f32 %v9720_v14, %v9720_v14  ;;  %v3954_v13 = vmul.f32 %v9723_v25, %v9723_v25  ;;  %v9727_v17 = vld [vmem:[#allocation22_spill] sm:$0xff] }
 0x2f7   :  { %9715 = vst [vmem:[#allocation75_spill] sm:$0xff] %v9046_v31  ;;  %9716 = vst [vmem:[#allocation76_spill] sm:$0xff] %v9049_v26  ;;  %v9068_v26 = vadd.f32 %v9046_v31, %v9024_v52  ;;  %v9072_v54 = vadd.f32 %v9051_v58, %v9028_v55  ;;  %7609 = vmatprep.mubr.msk.f32.mxu1 %vm77_vm0, %v2996_v50  ;;  %7603 = vmatmul.mubr.msk.f32.vlgmr.msra.gmra.mrb[42].mxu0 %vm77_vm0, %v7548_v16  ;;  %v7562_v35 = vpop.f32.mrb[36].mxu0 }
 0x2f8   :  { %9717 = vst [vmem:[#allocation77_spill] sm:$0xff] %v9051_v58  ;;  %9718 = vst [vmem:[#allocation78_spill] sm:$0xff] %v9057_v19  ;;  %7610 = vmatmul.mubr.msk.f32.vlgmr.msra.gmra.mrb[42].mxu1 %vm77_vm0, %v7555_v29  ;;  %8043 = vmatpush3.bf16.msra.mxu0 %v8607_v59  ;;  %v7569_v50 = vpop.f32.mrb[36].mxu1  ;;  %v3071_v16 = vpop.f32.mrb[37].mxu0  ;;  %v8056_v29 = vpack.c.bf16 %v3954_v13, %v3953_v7  ;;  %v9726_v58 = vld [vmem:[#allocation21_spill] sm:$0xff]  ;;  %v3958_v48 = vmul.f32 %v9727_v17, %v9727_v17  ;;  %v9733_v17 = vld [vmem:[#allocation28_spill] sm:$0xff] }
 0x2f9   :  { %9719 = vst [vmem:[#allocation79_spill] sm:$0xff] %v9060_v46  ;;  %9721 = vst [vmem:[#allocation17_spill] sm:$0xff] %v9068_v26  ;;  %v9724_v46 = vld [vmem:[#allocation19_spill] sm:$0xff]  ;;  %v9725_v26 = vld [vmem:[#allocation20_spill] sm:$0xff]  ;;  %8047 = vmatpush3.bf16.msra.mxu1 %v8610_v61  ;;  %8049 = vmatprep.subr.bf16.mxu0 %v8618_v24  ;;  %v3957_v53 = vmul.f32 %v9726_v58, %v9726_v58 }
 0x2fa   :  { %9722 = vst [vmem:[#allocation80_spill] sm:$0xff] %v9072_v54  ;;  %v3955_v19 = vmul.f32 %v9724_v46, %v9724_v46  ;;  %v3956_v31 = vmul.f32 %v9725_v26, %v9725_v26  ;;  %8053 = vmatprep.subr.bf16.mxu1 %v8622_v33  ;;  %v3146_v54 = vpop.f32.mrb[37].mxu1  ;;  %7616 = vmatprep.mubr.msk.f32.mxu0 %vm77_vm0, %v3071_v16 }
 0x2fb   :  { %7623 = vmatprep.mubr.msk.f32.mxu1 %vm77_vm0, %v3146_v54  ;;  %7617 = vmatmul.mubr.msk.f32.vlgmr.msra.gmra.mrb[44].mxu0 %vm77_vm0, %v7562_v35  ;;  %v7576_v0 = vpop.f32.mrb[38].mxu0  ;;  %v8064_v54 = vpack.c.bf16 %v3958_v48, %v3957_v53  ;;  %v9731_v35 = vld [vmem:[#allocation26_spill] sm:$0xff]  ;;  %v9734_v53 = vld [vmem:[#allocation29_spill] sm:$0xff] }
 0x2fc   :  { %v8060_v3 = vpack.c.bf16 %v3956_v31, %v3955_v19  ;;  %7624 = vmatmul.mubr.msk.f32.vlgmr.msra.gmra.mrb[44].mxu1 %vm77_vm0, %v7569_v50  ;;  %v7583_v7 = vpop.f32.mrb[38].mxu1  ;;  %8051 = vmatpush3.bf16.msra.mxu0 %v8618_v24  ;;  %v3221_v13 = vpop.f32.mrb[39].mxu0  ;;  %v9730_v31 = vld [vmem:[#allocation25_spill] sm:$0xff]  ;;  %v3962_v37 = vmul.f32 %v9731_v35, %v9731_v35  ;;  %v8068_v50 = vpack.c.bf16 %v3960_v62, %v3959_v9  ;;  %v9735_v62 = vld [vmem:[#allocation30_spill] sm:$0xff] }
 0x2fd   :  { %8055 = vmatpush3.bf16.msra.mxu1 %v8622_v33  ;;  %v3296_v16 = vpop.f32.mrb[39].mxu1  ;;  %7630 = vmatprep.mubr.msk.f32.mxu0 %vm77_vm0, %v3221_v13  ;;  %v3961_v19 = vmul.f32 %v9730_v31, %v9730_v31  ;;  %v3964_v13 = vmul.f32 %v9733_v17, %v9733_v17  ;;  %v3965_v9 = vmul.f32 %v9734_v53, %v9734_v53 }
 0x2fe   :  { %7637 = vmatprep.mubr.msk.f32.mxu1 %vm77_vm0, %v3296_v16  ;;  %8057 = vmatprep.subr.bf16.mxu0 %v8056_v29  ;;  %v3966_v48 = vmul.f32 %v9735_v62, %v9735_v62 }
 0x2ff   :  { %7631 = vmatmul.mubr.msk.f32.vlgmr.msra.gmra.mrb[46].mxu0 %vm77_vm0, %v7576_v0  ;;  %8061 = vmatprep.subr.bf16.mxu1 %v8060_v3  ;;  %v8072_v0 = vpack.c.bf16 %v3962_v37, %v3961_v19 }
 0x300   :  { %7638 = vmatmul.mubr.msk.f32.vlgmr.msra.gmra.mrb[46].mxu1 %vm77_vm0, %v7583_v7  ;;  %8059 = vmatpush3.bf16.msra.mxu0 %v8056_v29  ;;  %v8076_v29 = vpack.c.bf16 %v3964_v13, %v3963_v63 }
 0x301   :  { %8063 = vmatpush3.bf16.msra.mxu1 %v8060_v3  ;;  %7644 = vmatprep.mubr.msk.f32.mxu0 %vm77_vm0, %v8491_v5  ;;  %v9736_v3 = vld [vmem:[#allocation31_spill] sm:$0xff]  ;;  %v9737_v5 = vld [vmem:[#allocation32_spill] sm:$0xff] }
 0x302   :  { %7651 = vmatprep.mubr.msk.f32.mxu1 %vm77_vm0, %v8493_v6  ;;  %8065 = vmatprep.subr.bf16.mxu0 %v8064_v54  ;;  %v3967_v7 = vmul.f32 %v9736_v3, %v9736_v3  ;;  %v3968_v16 = vmul.f32 %v9737_v5, %v9737_v5  ;;  %v8080_v6 = vpack.c.bf16 %v3966_v48, %v3965_v9 }
 0x303   :  { %7645 = vmatmul.mubr.msk.f32.vlgmr.msra.gmra.mrb[48].mxu0 %vm77_vm0, %v8509_v12  ;;  %8069 = vmatprep.subr.bf16.mxu1 %v8068_v50 }
 0x304   :  { %7652 = vmatmul.mubr.msk.f32.vlgmr.msra.gmra.mrb[48].mxu1 %vm77_vm0, %v8515_v15  ;;  %8067 = vmatpush3.bf16.msra.mxu0 %v8064_v54  ;;  %v8084_v12 = vpack.c.bf16 %v3968_v16, %v3967_v7  ;;  %v8224_v7 = vld [vmem:[#allocation2] sm:$0xff] }
 0x305   :  { %8071 = vmatpush3.bf16.msra.mxu1 %v8068_v50  ;;  %7658 = vmatprep.mubr.msk.f32.mxu0 %vm77_vm0, %v8521_v18  ;;  %v8227_v18 = vld [vmem:[#allocation2 + $0x18] sm:$0xff] }
 0x306   :  { %7665 = vmatprep.mubr.msk.f32.mxu1 %vm77_vm0, %v8531_v22  ;;  %8073 = vmatprep.subr.bf16.mxu0 %v8072_v0  ;;  %v5220_v55 = vmul.f32 %v8227_v18, %v9725_v26  ;;  %v8228_v18 = vld [vmem:[#allocation2 + $0x20] sm:$0xff] }
 0x307   :  { %7659 = vmatmul.mubr.msk.f32.vlgmr.msra.gmra.mrb[50].mxu0 %vm77_vm0, %v8533_v23  ;;  %8077 = vmatprep.subr.bf16.mxu1 %v8076_v29 }
 0x308   :  { %7666 = vmatmul.mubr.msk.f32.vlgmr.msra.gmra.mrb[50].mxu1 %vm77_vm0, %v8547_v28  ;;  %8075 = vmatpush3.bf16.msra.mxu0 %v8072_v0  ;;  %v8225_v28 = vld [vmem:[#allocation2 + $0x8] sm:$0xff] }
 0x309   :  { %8079 = vmatpush3.bf16.msra.mxu1 %v8076_v29  ;;  %7672 = vmatprep.mubr.msk.f32.mxu0 %vm77_vm0, %v8553_v30  ;;  %v5217_v30 = vmul.f32 %v8224_v7, %v9720_v14 }
 0x30a   :  { %7679 = vmatprep.mubr.msk.f32.mxu1 %vm77_vm0, %v8559_v32  ;;  %8081 = vmatprep.subr.bf16.mxu0 %v8080_v6 }
 0x30b   :  { %7673 = vmatmul.mubr.msk.f32.vlgmr.msra.gmra.mrb[52].mxu0 %vm77_vm0, %v8565_v36  ;;  %8085 = vmatprep.subr.bf16.mxu1 %v8084_v12 }
 0x30c   :  { %7680 = vmatmul.mubr.msk.f32.vlgmr.msra.gmra.mrb[52].mxu1 %vm77_vm0, %v8569_v39  ;;  %8083 = vmatpush3.bf16.msra.mxu0 %v8080_v6 }
 0x30d   :  { %8087 = vmatpush3.bf16.msra.mxu1 %v8084_v12  ;;  %7686 = vmatprep.mubr.msk.f32.mxu0 %vm77_vm0, %v8573_v40 }
 0x30e   :  { %7693 = vmatprep.mubr.msk.f32.mxu1 %vm77_vm0, %v8579_v42  ;;  %8089 = vmatprep.subr.bf16.mxu0 %v8575_v41 }
 0x30f   :  { %7687 = vmatmul.mubr.msk.f32.vlgmr.msra.gmra.mrb[54].mxu0 %vm77_vm0, %v8585_v44  ;;  %8093 = vmatprep.subr.bf16.mxu1 %v8581_v43 }
 0x310   :  { %7694 = vmatmul.mubr.msk.f32.vlgmr.msra.gmra.mrb[54].mxu1 %vm77_vm0, %v8589_v45  ;;  %8091 = vmatpush3.bf16.msra.mxu0 %v8575_v41 }
 0x311   :  { %8095 = vmatpush3.bf16.msra.mxu1 %v8581_v43  ;;  %8097 = vmatprep.subr.bf16.mxu0 %v8601_v49 }
 0x312   :  { %8101 = vmatprep.subr.bf16.mxu1 %v8603_v51 }
 0x3c5   :  { %v9159_v15 = vpop.f32.mrb[40].mxu0 }
 0x3c6   :  { %v9163_v22 = vpop.f32.mrb[40].mxu1  ;;  %v9165_v23 = vpop.f32.mrb[41].mxu0 }
 0x3c7   :  { %v9171_v32 = vpop.f32.mrb[41].mxu1 }
 0x3ca   :  { %v9175_v39 = vpop.f32.mrb[42].mxu0 }
 0x3cb   :  { %v9179_v42 = vpop.f32.mrb[42].mxu1  ;;  %v9181_v44 = vpop.f32.mrb[43].mxu0 }
 0x3cc   :  { %v9187_v63 = vpop.f32.mrb[43].mxu1 }
 0x3ce   :  { %v9191_v19 = vpop.f32.mrb[44].mxu0 }
 0x3cf   :  { %v9195_v13 = vpop.f32.mrb[44].mxu1  ;;  %v9197_v0 = vpop.f32.mrb[45].mxu0 }
 0x3d0   :  { %v9203_v29 = vpop.f32.mrb[45].mxu1 }
 0x3d2   :  { %v9207_v16 = vpop.f32.mrb[46].mxu0 }
 0x3d3   :  { %v9211_v12 = vpop.f32.mrb[46].mxu1  ;;  %v9213_v50 = vpop.f32.mrb[47].mxu0 }
 0x3d4   :  { %v9219_v54 = vpop.f32.mrb[47].mxu1 }
 0x3d5   :  { %9738 = vst [vmem:[#allocation18_spill] sm:$0xff] %v9219_v54 }
 0x3d6   :  { %v7646_v37 = vpop.f32.mrb[48].mxu0 }
 0x3d7   :  { %v7653_v45 = vpop.f32.mrb[48].mxu1  ;;  %v4035_v40 = vpop.f32.mrb[49].mxu0 }
 0x3d8   :  { %v4110_v36 = vpop.f32.mrb[49].mxu1  ;;  %7700 = vmatprep.mubr.msk.f32.mxu0 %vm77_vm0, %v4035_v40  ;;  %v5218_v40 = vmul.f32 %v8225_v28, %v9723_v25 }
 0x3d9   :  { %7707 = vmatprep.mubr.msk.f32.mxu1 %vm77_vm0, %v4110_v36  ;;  %7701 = vmatmul.mubr.msk.f32.vlgmr.msra.gmra.mrb[56].mxu0 %vm77_vm0, %v7646_v37 }
 0x3da   :  { %7708 = vmatmul.mubr.msk.f32.vlgmr.msra.gmra.mrb[56].mxu1 %vm77_vm0, %v7653_v45  ;;  %v7660_v9 = vpop.f32.mrb[50].mxu0  ;;  %8099 = vmatpush3.bf16.msra.mxu0 %v8601_v49  ;;  %v8226_v45 = vld [vmem:[#allocation2 + $0x10] sm:$0xff]  ;;  %v8120_v7 = vpack.c.bf16 %v5218_v40, %v5217_v30  ;;  %v8231_v30 = vld [vmem:[#allocation2 + $0x38] sm:$0xff] }
 0x3db   :  { %v7667_v48 = vpop.f32.mrb[50].mxu1  ;;  %8103 = vmatpush3.bf16.msra.mxu1 %v8603_v51  ;;  %v4185_v6 = vpop.f32.mrb[51].mxu0  ;;  %8105 = vmatprep.subr.bf16.mxu0 %v8607_v59  ;;  %v5219_v37 = vmul.f32 %v8226_v45, %v9724_v46  ;;  %v8230_v45 = vld [vmem:[#allocation2 + $0x30] sm:$0xff]  ;;  %v9741_v40 = vld [vmem:[#allocation24_spill] sm:$0xff] }
 0x3dc   :  { %v4260_v36 = vpop.f32.mrb[51].mxu1  ;;  %7714 = vmatprep.mubr.msk.f32.mxu0 %vm77_vm0, %v4185_v6  ;;  %8109 = vmatprep.subr.bf16.mxu1 %v8610_v61  ;;  %v9739_v6 = vld [vmem:[#allocation22_spill] sm:$0xff]  ;;  %v5224_v54 = vmul.f32 %v8231_v30, %v9741_v40  ;;  %v8235_v30 = vld [vmem:[#allocation2 + $0x58] sm:$0xff] }
 0x3dd   :  { %7721 = vmatprep.mubr.msk.f32.mxu1 %vm77_vm0, %v4260_v36  ;;  %7715 = vmatmul.mubr.msk.f32.vlgmr.msra.gmra.mrb[58].mxu0 %vm77_vm0, %v7660_v9  ;;  %v8124_v26 = vpack.c.bf16 %v5220_v55, %v5219_v37  ;;  %v5221_v9 = vmul.f32 %v8228_v18, %v9726_v58  ;;  %v8233_v18 = vld [vmem:[#allocation2 + $0x48] sm:$0xff]  ;;  %v5228_v40 = vmul.f32 %v8235_v30, %v9733_v17 }
 0x3de   :  { %7722 = vmatmul.mubr.msk.f32.vlgmr.msra.gmra.mrb[58].mxu1 %vm77_vm0, %v7667_v48  ;;  %v7674_v14 = vpop.f32.mrb[52].mxu0  ;;  %8107 = vmatpush3.bf16.msra.mxu0 %v8607_v59  ;;  %v8229_v48 = vld [vmem:[#allocation2 + $0x28] sm:$0xff] }
 0x3df   :  { %v7681_v25 = vpop.f32.mrb[52].mxu1  ;;  %8111 = vmatpush3.bf16.msra.mxu1 %v8610_v61  ;;  %v4335_v28 = vpop.f32.mrb[53].mxu0  ;;  %8113 = vmatprep.subr.bf16.mxu0 %v8618_v24  ;;  %v5222_v36 = vmul.f32 %v8229_v48, %v9739_v6  ;;  %v9740_v61 = vld [vmem:[#allocation23_spill] sm:$0xff]  ;;  %v5226_v48 = vmul.f32 %v8233_v18, %v9731_v35  ;;  %v8247_v18 = vld [vmem:[#allocation7 + $0x38] sm:$0xff]  ;;  %v8254_v30 = vld [vmem:[#allocation7 + $0x68] sm:$0xff] }
 0x3e0   :  { %v4410_v46 = vpop.f32.mrb[53].mxu1  ;;  %7728 = vmatprep.mubr.msk.f32.mxu0 %vm77_vm0, %v4335_v28  ;;  %8117 = vmatprep.subr.bf16.mxu1 %v8622_v33  ;;  %v5223_v59 = vmul.f32 %v8230_v45, %v9740_v61  ;;  %v8234_v6 = vld [vmem:[#allocation2 + $0x50] sm:$0xff] }
 0x3e1   :  { %7735 = vmatprep.mubr.msk.f32.mxu1 %vm77_vm0, %v4410_v46  ;;  %7729 = vmatmul.mubr.msk.f32.vlgmr.msra.gmra.mrb[60].mxu0 %vm77_vm0, %v7674_v14  ;;  %v8128_v14 = vpack.c.bf16 %v5222_v36, %v5221_v9  ;;  %v8232_v46 = vld [vmem:[#allocation2 + $0x40] sm:$0xff]  ;;  %v5227_v45 = vmul.f32 %v8234_v6, %v9732_v57 }
 0x3e2   :  { %7736 = vmatmul.mubr.msk.f32.vlgmr.msra.gmra.mrb[60].mxu1 %vm77_vm0, %v7681_v25  ;;  %v7688_v28 = vpop.f32.mrb[54].mxu0  ;;  %8115 = vmatpush3.bf16.msra.mxu0 %v8618_v24  ;;  %v5225_v61 = vmul.f32 %v8232_v46, %v9730_v31  ;;  %v8132_v25 = vpack.c.bf16 %v5224_v54, %v5223_v59  ;;  %v8236_v9 = vld [vmem:[#allocation7] sm:$0xff]  ;;  %v8237_v31 = vld [vmem:[#allocation7 + $0x10] sm:$0xff]  ;;  %v8239_v54 = vld [vmem:[#allocation2 + $0x68] sm:$0xff] }
 0x3e3   :  { %v7695_v55 = vpop.f32.mrb[54].mxu1  ;;  %8119 = vmatpush3.bf16.msra.mxu1 %v8622_v33  ;;  %v4485_v58 = vpop.f32.mrb[55].mxu0  ;;  %8121 = vmatprep.subr.bf16.mxu0 %v8120_v7  ;;  %v8238_v36 = vld [vmem:[#allocation2 + $0x60] sm:$0xff]  ;;  %v5230_v57 = vmul.f32 %v8239_v54, %v9735_v62  ;;  %v8140_v17 = vpack.c.bf16 %v5228_v40, %v5227_v45  ;;  %v8245_v62 = vld [vmem:[#allocation7 + $0x30] sm:$0xff]  ;;  %v8255_v40 = vld [vmem:[#allocation7 + $0x78] sm:$0xff] }
 0x3e4   :  { %v4560_v37 = vpop.f32.mrb[55].mxu1  ;;  %7742 = vmatprep.mubr.msk.f32.mxu0 %vm77_vm0, %v4485_v58  ;;  %8125 = vmatprep.subr.bf16.mxu1 %v8124_v26  ;;  %v8136_v35 = vpack.c.bf16 %v5226_v48, %v5225_v61  ;;  %v5229_v59 = vmul.f32 %v8238_v36, %v9734_v53  ;;  %v8244_v53 = vld [vmem:[#allocation7 + $0x20] sm:$0xff]  ;;  %v8246_v61 = vld [vmem:[#allocation7 + $0x28] sm:$0xff]  ;;  %v8253_v45 = vld [vmem:[#allocation7 + $0x70] sm:$0xff] }
 0x3e5   :  { %7749 = vmatprep.mubr.msk.f32.mxu1 %vm77_vm0, %v4560_v37  ;;  %7743 = vmatmul.mubr.msk.f32.vlgmr.msra.gmra.mrb[62].mxu0 %vm77_vm0, %v7688_v28  ;;  %v8240_v28 = vld [vmem:[#allocation7 + $0x8] sm:$0xff]  ;;  %v8243_v37 = vld [vmem:[#allocation7 + $0x18] sm:$0xff]  ;;  %v8252_v6 = vld [vmem:[#allocation7 + $0x60] sm:$0xff] }
 0x3e6   :  { %7750 = vmatmul.mubr.msk.f32.vlgmr.msra.gmra.mrb[62].mxu1 %vm77_vm0, %v7695_v55  ;;  %8123 = vmatpush3.bf16.msra.mxu0 %v8120_v7  ;;  %v8241_v7 = vld [vmem:[#allocation2 + $0x70] sm:$0xff]  ;;  %v8242_v55 = vld [vmem:[#allocation2 + $0x78] sm:$0xff]  ;;  %v8144_v46 = vpack.c.bf16 %v5230_v57, %v5229_v59  ;;  %v8250_v48 = vld [vmem:[#allocation7 + $0x48] sm:$0xff] }
 0x3e7   :  { %8127 = vmatpush3.bf16.msra.mxu1 %v8124_v26  ;;  %7756 = vmatprep.mubr.msk.f32.mxu0 %vm77_vm0, %v8236_v9  ;;  %v5231_v26 = vmul.f32 %v8241_v7, %v9736_v3  ;;  %v5232_v58 = vmul.f32 %v8242_v55, %v9737_v5  ;;  %v8248_v5 = vld [vmem:[#allocation7 + $0x40] sm:$0xff]  ;;  %v9743_v54 = vld [vmem:[#allocation40_spill] sm:$0xff]  ;;  %v9745_v7 = vld [vmem:[#allocation38_spill] sm:$0xff] }
 0x3e8   :  { %7763 = vmatprep.mubr.msk.f32.mxu1 %vm77_vm0, %v8237_v31  ;;  %8129 = vmatprep.subr.bf16.mxu0 %v8128_v14  ;;  %v9742_v31 = vld [vmem:[#allocation34_spill] sm:$0xff]  ;;  %v6674_v57 = vadd.f32 0.0001, %v9743_v54 }
 0x3e9   :  { %7757 = vmatmul.mubr.msk.f32.vlgmr.msra.gmra.mrb[64].mxu0 %vm77_vm0, %v8240_v28  ;;  %8133 = vmatprep.subr.bf16.mxu1 %v8132_v25  ;;  %v8148_v3 = vpack.c.bf16 %v5232_v58, %v5231_v26  ;;  %v9744_v28 = vld [vmem:[#allocation36_spill] sm:$0xff]  ;;  %v9746_v58 = vld [vmem:[#allocation43_spill] sm:$0xff] }
 0x3ea   :  { %7764 = vmatmul.mubr.msk.f32.vlgmr.msra.gmra.mrb[64].mxu1 %vm77_vm0, %v8243_v37  ;;  %8131 = vmatpush3.bf16.msra.mxu0 %v8128_v14  ;;  %v8249_v14 = vld [vmem:[#allocation7 + $0x50] sm:$0xff]  ;;  %v9747_v37 = vld [vmem:[#allocation44_spill] sm:$0xff] }
 0x3eb   :  { %8135 = vmatpush3.bf16.msra.mxu1 %v8132_v25  ;;  %7770 = vmatprep.mubr.msk.f32.mxu0 %vm77_vm0, %v8244_v53  ;;  %v8251_v25 = vld [vmem:[#allocation7 + $0x58] sm:$0xff]  ;;  %v9748_v53 = vsub.f32 %v9159_v15, %v8857_v27  ;;  %v9755_v27 = vsub.f32 %v9171_v32, %v8884_v11  ;;  %v9760_v11 = vld [vmem:[#allocation53_spill] sm:$0xff] }
 0x3ec   :  { %7777 = vmatprep.mubr.msk.f32.mxu1 %vm77_vm0, %v8245_v62  ;;  %8137 = vmatprep.subr.bf16.mxu0 %v8136_v35 }
 0x3ed   :  { %7771 = vmatmul.mubr.msk.f32.vlgmr.msra.gmra.mrb[66].mxu0 %vm77_vm0, %v8246_v61  ;;  %8141 = vmatprep.subr.bf16.mxu1 %v8140_v17 }
 0x3ee   :  { %7778 = vmatmul.mubr.msk.f32.vlgmr.msra.gmra.mrb[66].mxu1 %vm77_vm0, %v8247_v18  ;;  %8139 = vmatpush3.bf16.msra.mxu0 %v8136_v35 }
 0x3ef   :  { %8143 = vmatpush3.bf16.msra.mxu1 %v8140_v17  ;;  %7784 = vmatprep.mubr.msk.f32.mxu0 %vm77_vm0, %v8248_v5  ;;  %v9751_v5 = vld [vmem:[#allocation48_spill] sm:$0xff] }
 0x3f0   :  { %7791 = vmatprep.mubr.msk.f32.mxu1 %vm77_vm0, %v8249_v14  ;;  %8145 = vmatprep.subr.bf16.mxu0 %v8144_v46  ;;  %v6678_v14 = vadd.f32 0.0001, %v9751_v5 }
 0x3f1   :  { %7785 = vmatmul.mubr.msk.f32.vlgmr.msra.gmra.mrb[68].mxu0 %vm77_vm0, %v8250_v48  ;;  %8149 = vmatprep.subr.bf16.mxu1 %v8148_v3  ;;  %v9752_v48 = vsub.f32 %v9163_v22, %v8861_v4  ;;  %v9757_v4 = vld [vmem:[#allocation49_spill] sm:$0xff] }
 0x3f2   :  { %7792 = vmatmul.mubr.msk.f32.vlgmr.msra.gmra.mrb[68].mxu1 %vm77_vm0, %v8251_v25  ;;  %8147 = vmatpush3.bf16.msra.mxu0 %v8144_v46  ;;  %v9749_v46 = vld [vmem:[#allocation41_spill] sm:$0xff] }
 0x3f3   :  { %8151 = vmatpush3.bf16.msra.mxu1 %v8148_v3  ;;  %7798 = vmatprep.mubr.msk.f32.mxu0 %vm77_vm0, %v8252_v6  ;;  %v9750_v3 = vld [vmem:[#allocation45_spill] sm:$0xff]  ;;  %v9753_v6 = vsub.f32 %v9165_v23, %v8865_v38 }
 0x3f4   :  { %7805 = vmatprep.mubr.msk.f32.mxu1 %vm77_vm0, %v8253_v45  ;;  %8153 = vmatprep.subr.bf16.mxu0 %v8575_v41  ;;  %v6675_v18 = vadd.f32 0.0001, %v9750_v3  ;;  %v9762_v3 = vsub.f32 %v9181_v44, %v8922_v2 }
 0x3f5   :  { %7799 = vmatmul.mubr.msk.f32.vlgmr.msra.gmra.mrb[70].mxu0 %vm77_vm0, %v8254_v30  ;;  %8157 = vmatprep.subr.bf16.mxu1 %v8581_v43 }
 0x3f6   :  { %7806 = vmatmul.mubr.msk.f32.vlgmr.msra.gmra.mrb[70].mxu1 %vm77_vm0, %v8255_v40  ;;  %8155 = vmatpush3.bf16.msra.mxu0 %v8575_v41  ;;  %v6676_v41 = vadd.f32 0.0001, %v9746_v58  ;;  %v9754_v40 = vld [vmem:[#allocation54_spill] sm:$0xff]  ;;  %v9759_v58 = vsub.f32 %v9175_v39, %v8909_v20  ;;  %v9764_v39 = vsub.f32 %v9187_v63, %v8935_v10  ;;  %v9769_v63 = vsub.f32 %v9191_v19, %v8961_v34 }
 0x3f7   :  { %8159 = vmatpush3.bf16.msra.mxu1 %v8581_v43  ;;  %8161 = vmatprep.subr.bf16.mxu0 %v8601_v49  ;;  %v6673_v43 = vadd.f32 0.0001, %v9747_v37  ;;  %v9775_v34 = vld [vmem:[#allocation70_spill] sm:$0xff] }
 0x3f8   :  { %8165 = vmatprep.subr.bf16.mxu1 %v8603_v51 }
 0x4ac   :  { %v7702_v9 = vpop.f32.mrb[56].mxu0 }
 0x4ad   :  { %v6546_v35 = vsub.f32 %v7702_v9, %v9742_v31  ;;  %v7709_v36 = vpop.f32.mrb[56].mxu1  ;;  %v4641_v59 = vpop.f32.mrb[57].mxu0  ;;  %v6680_v9 = vadd.f32 0.0001, %v9754_v40 }
 0x4ae   :  { %v6548_v17 = vsub.f32 %v7709_v36, %v9744_v28  ;;  %v6545_v26 = vsub.f32 %v4641_v59, %v9745_v7  ;;  %v4722_v55 = vpop.f32.mrb[57].mxu1 }
 0x4af   :  { %v6690_v62 = vadd.f32 %v6546_v35, %v9748_v53  ;;  %v6547_v61 = vsub.f32 %v4722_v55, %v9749_v46  ;;  %v9756_v35 = vld [vmem:[#allocation46_spill] sm:$0xff]  ;;  %v9761_v46 = vsub.f32 %v9179_v42, %v8915_v21 }
 0x4b0   :  { %v6692_v25 = vadd.f32 %v6548_v17, %v9752_v48  ;;  %v6689_v45 = vadd.f32 %v6545_v26, %v9753_v6  ;;  %v7716_v30 = vpop.f32.mrb[58].mxu0  ;;  %v9758_v17 = vld [vmem:[#allocation51_spill] sm:$0xff]  ;;  %v9763_v48 = vld [vmem:[#allocation56_spill] sm:$0xff]  ;;  %v9765_v21 = vld [vmem:[#allocation58_spill] sm:$0xff] }
 0x4b1   :  { %v6706_v31 = vadd.f32 0.0009, %v6690_v62  ;;  %v6691_v15 = vadd.f32 %v6547_v61, %v9755_v27  ;;  %v6550_v36 = vsub.f32 %v7716_v30, %v9756_v35  ;;  %v7723_v59 = vpop.f32.mrb[58].mxu1  ;;  %v4803_v54 = vpop.f32.mrb[59].mxu0  ;;  %v9766_v27 = vld [vmem:[#allocation57_spill] sm:$0xff] }
 0x4b2   :  { %v6708_v28 = vadd.f32 0.0009, %v6692_v25  ;;  %v6705_v7 = vadd.f32 0.0009, %v6689_v45  ;;  %v6552_v22 = vsub.f32 %v7723_v59, %v9757_v4  ;;  %v6549_v55 = vsub.f32 %v4803_v54, %v9758_v17  ;;  %v4884_v38 = vpop.f32.mrb[59].mxu1  ;;  %v9767_v35 = vld [vmem:[#allocation61_spill] sm:$0xff] }
 0x4b3   :  { %v9312_v23 = vmul.f32 %v6706_v31, %v6674_v57  ;;  %v6707_v26 = vadd.f32 0.0009, %v6691_v15  ;;  %v6694_v37 = vadd.f32 %v6550_v36, %v9759_v58  ;;  %v6551_v32 = vsub.f32 %v4884_v38, %v9760_v11  ;;  %v9768_v36 = vld [vmem:[#allocation60_spill] sm:$0xff]  ;;  %v9770_v4 = vld [vmem:[#allocation66_spill] sm:$0xff]  ;;  %v9772_v38 = vld [vmem:[#allocation63_spill] sm:$0xff] }
 0x4b4   :  { %v9318_v53 = vmul.f32 %v6708_v28, %v6676_v41  ;;  %v9320_v62 = vmul.f32 %v6705_v7, %v6673_v43  ;;  %v6696_v61 = vadd.f32 %v6552_v22, %v9761_v46  ;;  %v6693_v57 = vadd.f32 %v6549_v55, %v9762_v3  ;;  %v7730_v5 = vpop.f32.mrb[60].mxu0  ;;  %v9774_v46 = vld [vmem:[#allocation65_spill] sm:$0xff] }
 0x4b5   :  { %v6677_v25 = vadd.f32 0.0001, %v9763_v48  ;;  %v9329_v6 = vmul.f32 %v6707_v26, %v6675_v18  ;;  %v6710_v20 = vadd.f32 0.0009, %v6694_v37  ;;  %v6695_v41 = vadd.f32 %v6551_v32, %v9764_v39  ;;  %v7737_v43 = vpop.f32.mrb[60].mxu1  ;;  %v4965_v45 = vpop.f32.mrb[61].mxu0 }
 0x4b6   :  { %v6712_v30 = vadd.f32 0.0009, %v6696_v61  ;;  %v6709_v40 = vadd.f32 0.0009, %v6693_v57  ;;  %v6554_v42 = vsub.f32 %v7730_v5, %v9765_v21  ;;  %v5046_v31 = vpop.f32.mrb[61].mxu1  ;;  %v6556_v18 = vsub.f32 %v7737_v43, %v9767_v35  ;;  %v9773_v37 = vld [vmem:[#allocation68_spill] sm:$0xff] }
 0x4b7   :  { %v6679_v2 = vadd.f32 0.0001, %v9766_v27  ;;  %v9336_v44 = vmul.f32 %v6710_v20, %v6678_v14  ;;  %v6711_v15 = vadd.f32 0.0009, %v6695_v41  ;;  %v6682_v59 = vadd.f32 0.0001, %v9768_v36 }
 0x4b8   :  { %v9340_v54 = vmul.f32 %v6712_v30, %v6680_v9  ;;  %v9342_v10 = vmul.f32 %v6709_v40, %v6677_v25  ;;  %v6698_v28 = vadd.f32 %v6554_v42, %v9769_v63  ;;  %v7744_v7 = vpop.f32.mrb[62].mxu0  ;;  %v6684_v22 = vadd.f32 0.0001, %v9770_v4  ;;  %v9776_v57 = vld [vmem:[#allocation69_spill] sm:$0xff]  ;;  %v9779_v39 = vld [vmem:[#allocation72_spill] sm:$0xff] }
 0x4b9   :  { %v9348_v17 = vmul.f32 %v6711_v15, %v6679_v2  ;;  %v9771_v14 = vsub.f32 %v9195_v13, %v8967_v60  ;;  %v6553_v26 = vsub.f32 %v4965_v45, %v9772_v38  ;;  %v7751_v58 = vpop.f32.mrb[62].mxu1  ;;  %v5127_v9 = vpop.f32.mrb[63].mxu0  ;;  %v6681_v11 = vadd.f32 0.0001, %v9773_v37  ;;  %v9778_v13 = vld [vmem:[#allocation73_spill] sm:$0xff]  ;;  %v9783_v2 = vld [vmem:[#allocation75_spill] sm:$0xff] }
 0x4ba   :  { %v6714_v32 = vadd.f32 0.0009, %v6698_v28  ;;  %v6555_v61 = vsub.f32 %v5046_v31, %v9774_v46  ;;  %v6558_v19 = vsub.f32 %v7744_v7, %v9775_v34  ;;  %v5208_v3 = vpop.f32.mrb[63].mxu1  ;;  %v6683_v5 = vadd.f32 0.0001, %v9776_v57  ;;  %v9791_v46 = vld [vmem:[#allocation15_spill] sm:$0xff] }
 0x4bb   :  { %v6700_v55 = vadd.f32 %v6556_v18, %v9771_v14  ;;  %v9777_v25 = vsub.f32 %v9197_v0, %v8974_v47  ;;  %v6560_v20 = vsub.f32 %v7751_v58, %v9778_v13  ;;  %v6686_v41 = vadd.f32 0.0001, %v9779_v39  ;;  %v9787_v14 = vld [vmem:[#allocation18_spill] sm:$0xff]  ;;  %v9793_v57 = vld [vmem:[#allocation16_spill] sm:$0xff] }
 0x4bc   :  { %v9363_v43 = vmul.f32 %v6714_v32, %v6682_v59  ;;  %v9780_v45 = vsub.f32 %v9203_v29, %v8987_v8  ;;  %v9781_v40 = vsub.f32 %v9207_v16, %v9013_v1  ;;  %v7758_v42 = vpop.f32.mrb[64].mxu0  ;;  %v9782_v47 = vsub.f32 %v9211_v12, %v9017_v56  ;;  %v9784_v8 = vld [vmem:[#allocation77_spill] sm:$0xff]  ;;  %v9785_v1 = vld [vmem:[#allocation78_spill] sm:$0xff] }
 0x4bd   :  { %v6716_v48 = vadd.f32 0.0009, %v6700_v55  ;;  %v6697_v60 = vadd.f32 %v6553_v26, %v9777_v25  ;;  %v6557_v15 = vsub.f32 %v5127_v9, %v9783_v2  ;;  %v7765_v35 = vpop.f32.mrb[64].mxu1  ;;  %v5299_v18 = vpop.f32.mrb[65].mxu0  ;;  %v6559_v29 = vsub.f32 %v5208_v3, %v9784_v8  ;;  %v9788_v55 = vld [vmem:[#allocation33_spill] sm:$0xff] }
 0x4be   :  { %v6699_v30 = vadd.f32 %v6555_v61, %v9780_v45  ;;  %v6702_v21 = vadd.f32 %v6558_v19, %v9781_v40  ;;  %v6704_v0 = vadd.f32 %v6560_v20, %v9782_v47  ;;  %v5374_v63 = vpop.f32.mrb[65].mxu1  ;;  %7812 = vmatprep.mubr.msk.f32.mxu0 %vm77_vm0, %v5299_v18  ;;  %v6688_v16 = vadd.f32 0.0001, %v9785_v1  ;;  %v9790_v9 = vld [vmem:[#allocation17_spill] sm:$0xff]  ;;  %v9792_v61 = vld [vmem:[#allocation80_spill] sm:$0xff]  ;;  %v9797_v47 = vld [vmem:[#allocation42_spill] sm:$0xff] }
 0x4bf   :  { %v9371_v31 = vmul.f32 %v6716_v48, %v6684_v22  ;;  %v6713_v27 = vadd.f32 0.0009, %v6697_v60  ;;  %v9786_v56 = vsub.f32 %v9213_v50, %v9024_v52  ;;  %7819 = vmatprep.mubr.msk.f32.mxu1 %vm77_vm0, %v5374_v63  ;;  %7813 = vmatmul.mubr.msk.f32.vlgmr.msra.gmra.mrb[72].mxu0 %vm77_vm0, %v7758_v42  ;;  %v9789_v38 = vsub.f32 %v9787_v14, %v9788_v55  ;;  %v9795_v40 = vld [vmem:[#allocation37_spill] sm:$0xff]  ;;  %v9799_v18 = vld [vmem:[#allocation50_spill] sm:$0xff]  ;;  %v9806_v14 = vld [vmem:[#allocation71_spill] sm:$0xff] }
 0x4c0   :  { %v6715_v36 = vadd.f32 0.0009, %v6699_v30  ;;  %v6718_v59 = vadd.f32 0.0009, %v6702_v21  ;;  %v6720_v7 = vadd.f32 0.0009, %v6704_v0  ;;  %7820 = vmatmul.mubr.msk.f32.vlgmr.msra.gmra.mrb[72].mxu1 %vm77_vm0, %v7765_v35  ;;  %8163 = vmatpush3.bf16.msra.mxu0 %v8601_v49  ;;  %8192 = vrcp.f32 %v9312_v23 }
 0x4c1   :  { %v9380_v28 = vmul.f32 %v6713_v27, %v6681_v11  ;;  %v6701_v12 = vadd.f32 %v6557_v15, %v9786_v56  ;;  %v6703_v26 = vadd.f32 %v6559_v29, %v9789_v38  ;;  %v7772_v58 = vpop.f32.mrb[66].mxu0  ;;  %v6685_v52 = vadd.f32 0.0001, %v9790_v9  ;;  %v7779_v11 = vpop.f32.mrb[66].mxu1  ;;  %8167 = vmatpush3.bf16.msra.mxu1 %v8603_v51  ;;  %8169 = vmatprep.subr.bf16.mxu0 %v9791_v46  ;;  %v9794_v30 = vld [vmem:[#allocation35_spill] sm:$0xff]  ;;  %v9800_v23 = vld [vmem:[#allocation52_spill] sm:$0xff] }
 0x4c2   :  { %v9387_v4 = vmul.f32 %v6715_v36, %v6683_v5  ;;  %v9389_v22 = vmul.f32 %v6718_v59, %v6686_v41  ;;  %v9397_v50 = vmul.f32 %v6720_v7, %v6688_v16  ;;  %v5449_v32 = vpop.f32.mrb[67].mxu0  ;;  %v6687_v34 = vadd.f32 0.0001, %v9792_v61  ;;  %v5524_v3 = vpop.f32.mrb[67].mxu1  ;;  %8173 = vmatprep.subr.bf16.mxu1 %v9793_v57  ;;  %v9798_v15 = vld [vmem:[#allocation47_spill] sm:$0xff]  ;;  %v9803_v1 = vld [vmem:[#allocation62_spill] sm:$0xff] }
 0x4c3   :  { %v6717_v37 = vadd.f32 0.0009, %v6701_v12  ;;  %v6719_v19 = vadd.f32 0.0009, %v6703_v26  ;;  %7826 = vmatprep.mubr.msk.f32.mxu0 %vm77_vm0, %v5449_v32  ;;  %7833 = vmatprep.mubr.msk.f32.mxu1 %vm77_vm0, %v5524_v3  ;;  %v8380_v45 = vmov 0.0   ;;  %v6580_v21 = vmul.f32 2.0, %v9795_v40 }
 0x4c4   :  { %7827 = vmatmul.mubr.msk.f32.vlgmr.msra.gmra.mrb[74].mxu0 %vm77_vm0, %v7772_v58  ;;  %7834 = vmatmul.mubr.msk.f32.vlgmr.msra.gmra.mrb[74].mxu1 %vm77_vm0, %v7779_v11  ;;  %v7786_v51 = vpop.f32.mrb[68].mxu0  ;;  %78 = vst.msk [vmem:[#allocation10] sm:$0xff] %vm77_vm0, %v8380_v45  ;;  %79 = vst.msk [vmem:[#allocation10 + $0x8] sm:$0xff] %vm77_vm0, %v8380_v45  ;;  %8194 = vrcp.f32 %v9318_v53  ;;  %v6579_v0 = vmul.f32 2.0, %v9797_v47  ;;  %v6582_v35 = vmul.f32 2.0, %v9798_v15  ;;  %v6584_v36 = vmul.f32 2.0, %v9799_v18 }
 0x4c5   :  { %v9404_v49 = vmul.f32 %v6717_v37, %v6685_v52  ;;  %v9408_v5 = vmul.f32 %v6719_v19, %v6687_v34  ;;  %8171 = vmatpush3.bf16.msra.mxu0 %v9791_v46  ;;  %v7793_v48 = vpop.f32.mrb[68].mxu1  ;;  %8175 = vmatpush3.bf16.msra.mxu1 %v9793_v57  ;;  %v5599_v25 = vpop.f32.mrb[69].mxu0  ;;  %8196 = vrcp.f32 %v9320_v62  ;;  %v9437_v2 = vadd.f32 0.0001, %v6580_v21  ;;  %v9801_v59 = vld [vmem:[#allocation55_spill] sm:$0xff]  ;;  %v9804_v16 = vld [vmem:[#allocation64_spill] sm:$0xff] }
 0x4c6   :  { %8177 = vmatprep.subr.bf16.mxu0 %v8618_v24  ;;  %v5674_v60 = vpop.f32.mrb[69].mxu1  ;;  %7840 = vmatprep.mubr.msk.f32.mxu0 %vm77_vm0, %v5599_v25  ;;  %8198 = vrcp.f32 %v9329_v6  ;;  %v6581_v53 = vmul.f32 2.0, %v9800_v23  ;;  %v6583_v8 = vmul.f32 2.0, %v9801_v59  ;;  %v9802_v29 = vld [vmem:[#allocation59_spill] sm:$0xff]  ;;  %v6588_v6 = vmul.f32 2.0, %v9803_v1  ;;  %v9808_v32 = vld [vmem:[#allocation76_spill] sm:$0xff] }
 0x4c7   :  { %8181 = vmatprep.subr.bf16.mxu1 %v8622_v33  ;;  %7847 = vmatprep.mubr.msk.f32.mxu1 %vm77_vm0, %v5674_v60  ;;  %8200 = vrcp.f32 %v9336_v44  ;;  %v6586_v62 = vmul.f32 2.0, %v9802_v29  ;;  %v6585_v7 = vmul.f32 2.0, %v9804_v16  ;;  %v9451_v56 = vadd.f32 0.0001, %v6579_v0  ;;  %v9805_v12 = vld [vmem:[#allocation67_spill] sm:$0xff] }
 0x4c8   :  { %7841 = vmatmul.mubr.msk.f32.vlgmr.msra.gmra.mrb[76].mxu0 %vm77_vm0, %v7786_v51  ;;  %7848 = vmatmul.mubr.msk.f32.vlgmr.msra.gmra.mrb[76].mxu1 %vm77_vm0, %v7793_v48  ;;  %v7800_v13 = vpop.f32.mrb[70].mxu0  ;;  %8202 = vrcp.f32 %v9340_v54  ;;  %v6587_v44 = vmul.f32 2.0, %v9805_v12  ;;  %v6590_v55 = vmul.f32 2.0, %v9806_v14  ;;  %v9456_v38 = vadd.f32 0.0001, %v6582_v35  ;;  %v9807_v54 = vld [vmem:[#allocation74_spill] sm:$0xff] }
 0x4c9   :  { %8179 = vmatpush3.bf16.msra.mxu0 %v8618_v24  ;;  %v7807_v20 = vpop.f32.mrb[70].mxu1  ;;  %8183 = vmatpush3.bf16.msra.mxu1 %v8622_v33  ;;  %v5749_v39 = vpop.f32.mrb[71].mxu0  ;;  %v6578_v24 = vmul.f32 2.0, %v9794_v30  ;;  %v9796_v33 = vld [vmem:[#allocation39_spill] sm:$0xff]  ;;  %8204 = vrcp.f32 %v9342_v10  ;;  %v9458_v26 = vadd.f32 0.0001, %v6584_v36 }
 0x4ca   :  { %v5824_v41 = vpop.f32.mrb[71].mxu1  ;;  %7854 = vmatprep.mubr.msk.f32.mxu0 %vm77_vm0, %v5749_v39  ;;  %v6577_v42 = vmul.f32 2.0, %v9796_v33  ;;  %8206 = vrcp.f32 %v9348_v17  ;;  %v6592_v58 = vmul.f32 2.0, %v9807_v54  ;;  %v9462_v9 = vadd.f32 0.0001, %v6581_v53  ;;  %v8193_v37 = vpop.eup %8192 }
 0x4cb   :  { %7861 = vmatprep.mubr.msk.f32.mxu1 %vm77_vm0, %v5824_v41  ;;  %v9433_v27 = vadd.f32 0.0001, %v6578_v24  ;;  %8208 = vrcp.f32 %v9363_v43  ;;  %v9464_v52 = vadd.f32 0.0001, %v6583_v8  ;;  %v9466_v10 = vadd.f32 0.0001, %v6586_v62 }
 0x4cc   :  { %7855 = vmatmul.mubr.msk.f32.vlgmr.msra.gmra.mrb[78].mxu0 %vm77_vm0, %v7800_v13  ;;  %7862 = vmatmul.mubr.msk.f32.vlgmr.msra.gmra.mrb[78].mxu1 %vm77_vm0, %v7807_v20  ;;  %v9446_v63 = vadd.f32 0.0001, %v6577_v42  ;;  %8210 = vrcp.f32 %v9371_v31  ;;  %v9469_v11 = vadd.f32 0.0001, %v6588_v6  ;;  %v9471_v17 = vadd.f32 0.0001, %v6585_v7 }
 0x4cd   :  { %v6589_v46 = vmul.f32 2.0, %v9808_v32  ;;  %8212 = vrcp.f32 %v9380_v28  ;;  %v9475_v43 = vadd.f32 0.0001, %v6587_v44  ;;  %v9477_v19 = vadd.f32 0.0001, %v6590_v55  ;;  %v9809_v20 = vld [vmem:[#allocation79_spill] sm:$0xff] }
 0x4ce   :  { %v8195_v34 = vpop.eup %8194  ;;  %8214 = vrcp.f32 %v9387_v4  ;;  %v9481_v48 = vadd.f32 0.0001, %v6592_v58  ;;  %v9487_v39 = vmul.f32 2.0, %v9809_v20 }
 0x4cf   :  { %v8197_v51 = vpop.eup %8196  ;;  %8216 = vrcp.f32 %v9389_v22 }
 0x4d0   :  { %v8199_v13 = vpop.eup %8198  ;;  %8218 = vrcp.f32 %v9397_v50 }
 0x4d1   :  { %v8201_v45 = vpop.eup %8200  ;;  %8220 = vrcp.f32 %v9404_v49 }
 0x4d2   :  { %v8203_v21 = vpop.eup %8202  ;;  %8222 = vrcp.f32 %v9408_v5 }
 0x4d3   :  { %v8205_v36 = vpop.eup %8204 }
 0x4d4   :  { %v8207_v6 = vpop.eup %8206 }
 0x4d5   :  { %v9500_v58 = vpop.eup %8208 }
 0x592   :  { %v7814_v61 = vpop.f32.mrb[72].mxu0 }
 0x593   :  { %v6562_v3 = vsub.f32 %v7814_v61, %v9794_v30  ;;  %v7821_v31 = vpop.f32.mrb[72].mxu1  ;;  %v5905_v57 = vpop.f32.mrb[73].mxu0  ;;  %v9491_v30 = vadd.f32 0.0001, %v6589_v46 }
 0x594   :  { %v6564_v25 = vsub.f32 %v7821_v31, %v9795_v40  ;;  %v6561_v28 = vsub.f32 %v5905_v57, %v9796_v33  ;;  %v5986_v60 = vpop.f32.mrb[73].mxu1 }
 0x595   :  { %v6610_v4 = vmul.f32 2.0, %v6562_v3  ;;  %v6563_v41 = vsub.f32 %v5986_v60, %v9797_v47 }
 0x596   :  { %v6612_v22 = vmul.f32 2.0, %v6564_v25  ;;  %v6609_v24 = vmul.f32 2.0, %v6561_v28 }
 0x597   :  { %v7828_v40 = vpop.f32.mrb[74].mxu0  ;;  %v6626_v33 = vadd.f32 0.0009, %v6610_v4  ;;  %v6611_v42 = vmul.f32 2.0, %v6563_v41  ;;  %v7835_v35 = vpop.f32.mrb[74].mxu1 }
 0x598   :  { %v6566_v0 = vsub.f32 %v7828_v40, %v9798_v15  ;;  %v6067_v50 = vpop.f32.mrb[75].mxu0  ;;  %v6628_v53 = vadd.f32 0.0009, %v6612_v22  ;;  %v6625_v47 = vadd.f32 0.0009, %v6609_v24  ;;  %v6568_v8 = vsub.f32 %v7835_v35, %v9799_v18  ;;  %v6148_v49 = vpop.f32.mrb[75].mxu1 }
 0x599   :  { %v6565_v62 = vsub.f32 %v6067_v50, %v9800_v23  ;;  %v6642_v7 = vmul.f32 %v6626_v33, %v9433_v27  ;;  %v6627_v44 = vadd.f32 0.0009, %v6611_v42  ;;  %v6567_v5 = vsub.f32 %v6148_v49, %v9801_v59  ;;  %v9504_v18 = vpop.eup %8210 }
 0x59a   :  { %v6614_v55 = vmul.f32 2.0, %v6566_v0  ;;  %v6644_v15 = vmul.f32 %v6628_v53, %v9437_v2  ;;  %v6641_v46 = vmul.f32 %v6625_v47, %v9446_v63  ;;  %v6616_v61 = vmul.f32 2.0, %v6568_v8  ;;  %v9507_v4 = vpop.eup %8212 }
 0x59b   :  { %v6613_v3 = vmul.f32 2.0, %v6565_v62  ;;  %v7842_v31 = vpop.f32.mrb[76].mxu0  ;;  %v6740_v23 = vmul.f32 %v8193_v37, %v6642_v7  ;;  %v6643_v57 = vmul.f32 %v6627_v44, %v9451_v56  ;;  %v6615_v27 = vmul.f32 2.0, %v6567_v5  ;;  %v7849_v28 = vpop.f32.mrb[76].mxu1 }
 0x59c   :  { %v6630_v25 = vadd.f32 0.0009, %v6614_v55  ;;  %v6229_v60 = vpop.f32.mrb[77].mxu0  ;;  %v6744_v59 = vmul.f32 %v8195_v34, %v6644_v15  ;;  %v6738_v41 = vmul.f32 %v8197_v51, %v6641_v46  ;;  %v6632_v22 = vadd.f32 0.0009, %v6616_v61  ;;  %v6310_v24 = vpop.f32.mrb[77].mxu1 }
 0x59d   :  { %v6629_v2 = vadd.f32 0.0009, %v6613_v3  ;;  %v9509_v63 = vpop.eup %8214  ;;  %v6786_v40 = vsel %vm77_vm0, %v6740_v23, 0.0  ;;  %v6742_v33 = vmul.f32 %v8199_v13, %v6643_v57  ;;  %v6631_v42 = vadd.f32 0.0009, %v6615_v27 }
 0x59e   :  { %v6646_v37 = vmul.f32 %v6630_v25, %v9456_v38  ;;  %v9513_v56 = vpop.eup %8216  ;;  %v6787_v0 = vsel %vm77_vm0, %v6744_v59, 0.0  ;;  %v6771_v35 = vsel %vm77_vm0, %v6738_v41, 0.0  ;;  %v6648_v34 = vmul.f32 %v6632_v22, %v9458_v26 }
 0x59f   :  { %v6645_v51 = vmul.f32 %v6629_v2, %v9462_v9  ;;  %v7856_v50 = vpop.f32.mrb[78].mxu0  ;;  %v9519_v53 = vpop.eup %8218  ;;  %v6788_v47 = vadd.f32 %v6787_v0, %v6786_v40  ;;  %v6772_v8 = vsel %vm77_vm0, %v6742_v33, 0.0  ;;  %v6647_v38 = vmul.f32 %v6631_v42, %v9464_v52 }
 0x5a0   :  { %v6748_v13 = vmul.f32 %v8201_v45, %v6646_v37  ;;  %v7863_v62 = vpop.f32.mrb[78].mxu1  ;;  %v6391_v49 = vpop.f32.mrb[79].mxu0  ;;  %v6773_v44 = vadd.f32 %v6772_v8, %v6771_v35  ;;  %v6752_v55 = vmul.f32 %v8203_v21, %v6648_v34  ;;  %v6570_v15 = vsub.f32 %v7842_v31, %v9802_v29 }
 0x5a1   :  { %v8221_v7 = vpop.eup %8220  ;;  %v6746_v5 = vmul.f32 %v8205_v36, %v6645_v51  ;;  %v6472_v26 = vpop.f32.mrb[79].mxu1  ;;  %v6750_v61 = vmul.f32 %v8207_v6, %v6647_v38  ;;  %v6572_v3 = vsub.f32 %v7849_v28, %v9803_v1  ;;  %v6569_v45 = vsub.f32 %v6229_v60, %v9804_v16 }
 0x5a2   :  { %v9524_v46 = vpop.eup %8222  ;;  %v6789_v9 = vsel %vm77_vm0, %v6748_v13, 0.0  ;;  %v6791_v52 = vsel %vm77_vm0, %v6752_v55, 0.0  ;;  %v6618_v25 = vmul.f32 2.0, %v6570_v15  ;;  %v6571_v41 = vsub.f32 %v6310_v24, %v9805_v12 }
 0x5a3   :  { %v6790_v23 = vadd.f32 %v6789_v9, %v6788_v47  ;;  %v6774_v57 = vsel %vm77_vm0, %v6746_v5, 0.0  ;;  %v6776_v36 = vsel %vm77_vm0, %v6750_v61, 0.0  ;;  %v6620_v29 = vmul.f32 2.0, %v6572_v3  ;;  %v6770_v61 = vld [vmem:[#allocation10 + $0x8] sm:$0xff] }
 0x5a4   :  { %v6775_v21 = vadd.f32 %v6774_v57, %v6773_v44  ;;  %v6617_v31 = vmul.f32 2.0, %v6569_v45  ;;  %v6634_v59 = vadd.f32 0.0009, %v6618_v25  ;;  %v6574_v6 = vsub.f32 %v7856_v50, %v9806_v14  ;;  %v6769_v45 = vld [vmem:[#allocation10] sm:$0xff] }
 0x5a5   :  { %v6792_v27 = vadd.f32 %v6791_v52, %v6790_v23  ;;  %v6636_v28 = vadd.f32 0.0009, %v6620_v29  ;;  %v6576_v60 = vsub.f32 %v7863_v62, %v9807_v54  ;;  %v6619_v2 = vmul.f32 2.0, %v6571_v41 }
 0x5a6   :  { %v6777_v1 = vadd.f32 %v6776_v36, %v6775_v21  ;;  %v6633_v16 = vadd.f32 0.0009, %v6617_v31  ;;  %v6650_v22 = vmul.f32 %v6634_v59, %v9466_v10  ;;  %v6622_v40 = vmul.f32 2.0, %v6574_v6 }
 0x5a7   :  { %v6573_v33 = vsub.f32 %v6391_v49, %v9808_v32  ;;  %v6652_v37 = vmul.f32 %v6636_v28, %v9469_v11  ;;  %v6624_v0 = vmul.f32 2.0, %v6576_v60  ;;  %v6575_v12 = vsub.f32 %v6472_v26, %v9809_v20 }
 0x5a8   :  { %v6649_v42 = vmul.f32 %v6633_v16, %v9471_v17  ;;  %v6756_v14 = vmul.f32 %v9500_v58, %v6650_v22  ;;  %v6635_v24 = vadd.f32 0.0009, %v6619_v2  ;;  %v6638_v35 = vadd.f32 0.0009, %v6622_v40 }
 0x5a9   :  { %v6621_v34 = vmul.f32 2.0, %v6573_v33  ;;  %v6760_v54 = vmul.f32 %v9504_v18, %v6652_v37  ;;  %v6640_v51 = vadd.f32 0.0009, %v6624_v0  ;;  %v6623_v50 = vmul.f32 2.0, %v6575_v12 }
 0x5aa   :  { %v6754_v10 = vmul.f32 %v9507_v4, %v6649_v42  ;;  %v6793_v32 = vsel %vm77_vm0, %v6756_v14, 0.0  ;;  %v6651_v11 = vmul.f32 %v6635_v24, %v9475_v43  ;;  %v6654_v17 = vmul.f32 %v6638_v35, %v9477_v19 }
 0x5ab   :  { %v6637_v47 = vadd.f32 0.0009, %v6621_v34  ;;  %v6794_v8 = vadd.f32 %v6793_v32, %v6792_v27  ;;  %v6795_v20 = vsel %vm77_vm0, %v6760_v54, 0.0  ;;  %v6656_v13 = vmul.f32 %v6640_v51, %v9481_v48 }
 0x5ac   :  { %v6778_v58 = vsel %vm77_vm0, %v6754_v10, 0.0  ;;  %v6758_v18 = vmul.f32 %v9509_v63, %v6651_v11  ;;  %v6764_v4 = vmul.f32 %v9513_v56, %v6654_v17  ;;  %v6607_v49 = vadd.f32 0.0001, %v9487_v39 }
 0x5ad   :  { %v6779_v38 = vadd.f32 %v6778_v58, %v6777_v1  ;;  %v6653_v62 = vmul.f32 %v6637_v47, %v9491_v30  ;;  %v6796_v43 = vadd.f32 %v6795_v20, %v6794_v8  ;;  %v6768_v19 = vmul.f32 %v9519_v53, %v6656_v13 }
 0x5ae   :  { %v6639_v44 = vadd.f32 0.0009, %v6623_v50  ;;  %v6780_v55 = vsel %vm77_vm0, %v6758_v18, 0.0  ;;  %v6797_v5 = vsel %vm77_vm0, %v6764_v4, 0.0 }
 0x5af   :  { %v6762_v15 = vmul.f32 %v8221_v7, %v6653_v62  ;;  %v6781_v26 = vadd.f32 %v6780_v55, %v6779_v38  ;;  %v6798_v48 = vadd.f32 %v6797_v5, %v6796_v43  ;;  %v6799_v63 = vsel %vm77_vm0, %v6768_v19, 0.0 }
 0x5b0   :  { %v6655_v9 = vmul.f32 %v6639_v44, %v6607_v49 }
 0x5b1   :  { %v6782_v56 = vsel %vm77_vm0, %v6762_v15, 0.0  ;;  %v6800_v30 = vadd.f32 %v6799_v63, %v6798_v48 }
 0x5b2   :  { %v6783_v3 = vadd.f32 %v6782_v56, %v6781_v26  ;;  %v6766_v39 = vmul.f32 %v9524_v46, %v6655_v9 }
 0x5b3   :  { %v6802_v23 = vadd.f32 %v6800_v30, %v6770_v61 }
 0x5b4   :  { %v6784_v53 = vsel %vm77_vm0, %v6766_v39, 0.0 }
 0x5b5   :  { %v6785_v52 = vadd.f32 %v6784_v53, %v6783_v3  ;;  %6804 = vst.msk [vmem:[#allocation10 + $0x8] sm:$0xff] %vm77_vm0, %v6802_v23 }
 0x5b7   :  { %v6801_v7 = vadd.f32 %v6785_v52, %v6769_v45 }
 0x5b9   :  { %6803 = vst.msk [vmem:[#allocation10] sm:$0xff] %vm77_vm0, %v6801_v7 }
 0x5ba   :  { %8355 = shalt.err (!%p8352_p8)
}
 0x5bb   :  { %s8356_s15 = scalar_lea.hbm %s9581_s4, 256 }
 0x5bc   :  { %p8357_p9 = scmp.ne.s32.totalorder %s9581_s4, %s8356_s15  ;;  %p8360_p10 = scmp.lt.u32.totalorder %s8356_s15, %s9581_s4 }
 0x5be   :  { %p8362_p11 = pnand %p8360_p10, %p8357_p9 }
 0x5c0   :  { %8365 = shalt.err (!%p8362_p11)
}
 0x5c1   :  { %6816 = dma.vmem_to_hbm [thread:$0]  %s6811_s12, 256, %s9581_s4, [#allocation4], %s8376_s27, %s8376_s27, %s8377_s28  }
 0x5c2   :  { %8372 = dma.done.wait [#allocation4], 256  }
 0x5c3   :  { %8373 = vsyncadd [#allocation4], 4294967040 }
 0x5c4   :  { %6820 = vsyncpa [#allocation3], 1 }
 0x5c5   :  { %6821 = vsyncpa [#allocation6], 1 }
 0x5c6   :  { %6822 = vsyncpa [#allocation9], 1 }
 0x5c7   :  { %6823 = vsyncpa [#allocation4], 1 }

</bundles_post_ra>
